<compile_context>
chip_gen: v7x
topology: tpu7x:2x2x1
jax: 0.10.0
libtpu: 0.0.40
codegen_flags: <defaults>
</compile_context>

<pallas_src>
import jax
import jax.numpy as jnp
from jax.experimental import pallas as pl
from jax.experimental.pallas import tpu as pltpu

IN_FEATURES = 2048
HIDDEN = 512
NUM_CLASSES = 8  # stand-in for config.num_classes

LANE = 128
SUBLANE = 16  # row granularity (bf16 packs 16 rows per vreg)


def _round_up(x, m):
    return (x + m - 1) // m * m


# --------------------------------------------------------------------------- kernel
def _mlp_kernel(x_ref, w1_ref, b1_ref, w2_ref, b2_ref, o_ref):
    # Cast to bf16 inside the kernel (hidden under the MXU); no-op if already bf16.
    x = x_ref[...].astype(jnp.bfloat16)
    # fc1: [TB, 2048]bf16 @ [2048, 512]bf16 -> [TB, 512]f32 (MXU, f32 accumulate)
    h = jnp.dot(x, w1_ref[...], preferred_element_type=jnp.float32)
    h = jnp.maximum(h + b1_ref[...], 0.0)  # f32 bias + ReLU epilogue (VPU)
    # dropout(p=0.5) == identity in eval/inference mode
    # TODO(synk): training-mode dropout (mask + 1/(1-p) scale) not wired in.
    # fc2: [TB, 512]bf16 @ [512, C_pad]bf16 -> [TB, C_pad]f32
    y = jnp.dot(h.astype(jnp.bfloat16), w2_ref[...],
                preferred_element_type=jnp.float32)
    o_ref[...] = (y + b2_ref[...]).astype(o_ref.dtype)


# ---------------------------------------------------------------- one-time param prep
def prepare_params(w1, b1, w2, b2):
    """Call ONCE at parameter-load time (not per forward call).

    w1: [512, 2048], b1: [512], w2: [C, 512], b2: [C]  (PyTorch Linear layout).
    Returns kernel-ready params: transposed [in, out], bf16 weights, f32 biases,
    fc2 output dim padded to a multiple of 128 lanes.
    """
    num_classes = w2.shape[0]
    c_pad = _round_up(num_classes, LANE)

    w1_t = jnp.asarray(w1, jnp.float32).T.astype(jnp.bfloat16)         # [2048, 512]
    b1_r = jnp.asarray(b1, jnp.float32).reshape(1, HIDDEN)             # [1, 512]

    w2_t = jnp.zeros((HIDDEN, c_pad), jnp.bfloat16)
    w2_t = w2_t.at[:, :num_classes].set(
        jnp.asarray(w2, jnp.float32).T.astype(jnp.bfloat16))           # [512, C_pad]
    b2_r = jnp.zeros((1, c_pad), jnp.float32)
    b2_r = b2_r.at[:, :num_classes].set(jnp.asarray(b2, jnp.float32))  # [1, C_pad]

    return w1_t, b1_r, w2_t, b2_r, num_classes


# ----------------------------------------------------------------- batch tile choice
def _batch_tile_cap():
    """Per-chip cap on rows per grid step."""
    try:
        kind = jax.devices()[0].device_kind.lower()
    except Exception:
        kind = ""
    if "v6" in kind or "v7" in kind:
        # ~0.35us/step overhead vs ~0.6us fc1 MXU work per 256 rows: amortize with
        # bigger tiles; ~19 MiB footprint at TB=1024 fits the 32 MiB default scope.
        return 1024
    # v5e (and unknown): fc1 tile is compute-bound, and the 16 MiB default scoped
    # VMEM is the binding constraint -> keep tiles modest.
    return 512


def _choose_batch_tile(B, cap):
    cap = max(SUBLANE, (cap // SUBLANE) * SUBLANE)
    if B <= cap:
        return _round_up(B, SUBLANE)  # single grid step
    # Largest tile <= cap keeping batch-padding waste small (<= ~B/8),
    # e.g. B=300 will not be padded out to 512 rows of wasted MXU work.
    for tb in range(cap, SUBLANE - 1, -SUBLANE):
        if _round_up(B, tb) - B <= max(B // 8, SUBLANE):
            return tb
    return SUBLANE


# ------------------------------------------------------------------------- forward
def neural_net_forward(features, w1_t, b1_r, w2_t, b2_r, num_classes):
    """features: [B, ...] flattened to [B, 2048]. Params from prepare_params()."""
    B = features.shape[0]
    x = features.reshape(B, -1)  # flatten only; dtype untouched (cast happens in-kernel)
    assert x.shape[1] == IN_FEATURES

    c_pad = w2_t.shape[1]
    TB = _choose_batch_tile(B, _batch_tile_cap())
    b_pad = _round_up(B, TB)
    if b_pad != B:
        # TODO(synk): handle the ragged tail in-kernel to avoid this extra HBM copy of x.
        x = jnp.pad(x, ((0, b_pad - B), (0, 0)))
    grid = (b_pad // TB,)

    # VMEM footprint: double-buffered x/out tiles + single-buffered resident weights.
    weight_bytes = w1_t.size * 2 + w2_t.size * 2 + b1_r.size * 4 + b2_r.size * 4
    est_vmem = (2 * TB * IN_FEATURES * x.dtype.itemsize
                + 2 * TB * c_pad * 4
                + weight_bytes)
    compiler_kwargs = dict(dimension_semantics=("parallel",))
    if est_vmem > (14 << 20):  # would exceed the smallest default scope (v5e: 16 MiB)
        compiler_kwargs["vmem_limit_bytes"] = int(est_vmem) + (8 << 20)

    const = lambda i: (0, 0)
    out = pl.pallas_call(
        _mlp_kernel,
        out_shape=jax.ShapeDtypeStruct((b_pad, c_pad), jnp.float32),
        grid=grid,
        in_specs=[
            pl.BlockSpec((TB, IN_FEATURES), lambda i: (i, 0)),  # x tile (double-buffered)
            # Constant-index weight/bias blocks: single-buffer them (saves ~2.2 MiB
            # of VMEM; no per-step re-DMA).
            pl.BlockSpec((IN_FEATURES, HIDDEN), const, pipeline_mode=pl.Buffered(1)),
            pl.BlockSpec((1, HIDDEN), const, pipeline_mode=pl.Buffered(1)),
            pl.BlockSpec((HIDDEN, c_pad), const, pipeline_mode=pl.Buffered(1)),
            pl.BlockSpec((1, c_pad), const, pipeline_mode=pl.Buffered(1)),
        ],
        out_specs=pl.BlockSpec((TB, c_pad), lambda i: (i, 0)),
        compiler_params=pltpu.CompilerParams(**compiler_kwargs),
    )(x, w1_t, b1_r, w2_t, b2_r)

    return out[:B, :num_classes]


# ---------------------------------------------------------------------------- init
def _init_params(key):
    """Deterministic synthetic init matching nn.Linear shapes."""
    k1, k2, k3, k4 = jax.random.split(key, 4)
    lim1 = 1.0 / (IN_FEATURES ** 0.5)
    lim2 = 1.0 / (HIDDEN ** 0.5)
    w1 = jax.random.uniform(k1, (HIDDEN, IN_FEATURES), jnp.float32, -lim1, lim1)
    b1 = jax.random.uniform(k2, (HIDDEN,), jnp.float32, -lim1, lim1)
    w2 = jax.random.uniform(k3, (NUM_CLASSES, HIDDEN), jnp.float32, -lim2, lim2)
    b2 = jax.random.uniform(k4, (NUM_CLASSES,), jnp.float32, -lim2, lim2)
    return w1, b1, w2, b2


if __name__ == "__main__":
    key = jax.random.PRNGKey(0)
    k_x, k_p = jax.random.split(key)

    # features: [B=2, 2, 32, 32] -> flattened to [2, 2048] inside forward
    B = 2
    features = jax.random.normal(k_x, (B, 2, 32, 32), jnp.float32)
    w1, b1, w2, b2 = _init_params(k_p)

    params = prepare_params(w1, b1, w2, b2)   # one-time weight prep
    out = neural_net_forward(features, *params)
    out = jax.block_until_ready(out)

    # Reference check (pure JAX) with the same bf16 rounding of matmul inputs and
    # f32 accumulation the kernel uses.
    f32 = jnp.float32
    xf = features.reshape(B, -1)
    xb = xf.astype(jnp.bfloat16).astype(f32)
    w1b = w1.astype(jnp.bfloat16).astype(f32)
    w2b = w2.astype(jnp.bfloat16).astype(f32)
    h_ref = jnp.maximum(xb @ w1b.T + b1, 0.0)
    ref = h_ref.astype(jnp.bfloat16).astype(f32) @ w2b.T + b2

    assert out.shape == (B, NUM_CLASSES)
    assert jnp.allclose(out, ref, atol=1e-3, rtol=1e-3)

    print("KERNEL_OK")
</pallas_src>

<mosaic_0001>
module attributes {stable_mosaic.version = 11 : i64} {
  func.func @_mlp_kernel(%arg0: i32, %arg1: memref<16x2048xf32, #tpu.memory_space<vmem>>, %arg2: memref<2048x512xbf16, #tpu.memory_space<vmem>>, %arg3: memref<1x512xf32, #tpu.memory_space<vmem>>, %arg4: memref<512x128xbf16, #tpu.memory_space<vmem>>, %arg5: memref<1x128xf32, #tpu.memory_space<vmem>>, %arg6: memref<16x128xf32, #tpu.memory_space<vmem>>) attributes {dimension_semantics = [#tpu.dimension_semantics<parallel>], iteration_bounds = array<i64: 1>, scalar_prefetch = 0 : i64, scratch_operands = 0 : i64, tpu.core_type = #tpu.core_type<tc>, window_params = [{transform_indices = @transform_0, window_bounds = array<i64: 16, 2048>}, {pipeline_mode = #tpu.pipeline_mode<synchronous>, transform_indices = @transform_1, window_bounds = array<i64: 2048, 512>}, {pipeline_mode = #tpu.pipeline_mode<synchronous>, transform_indices = @transform_2, window_bounds = array<i64: 1, 512>}, {pipeline_mode = #tpu.pipeline_mode<synchronous>, transform_indices = @transform_3, window_bounds = array<i64: 512, 128>}, {pipeline_mode = #tpu.pipeline_mode<synchronous>, transform_indices = @transform_4, window_bounds = array<i64: 1, 128>}, {transform_indices = @transform_5, window_bounds = array<i64: 16, 128>}]} {
    %c0 = arith.constant 0 : index
    %c0_0 = arith.constant 0 : index
    %0 = vector.load %arg1[%c0, %c0_0] : memref<16x2048xf32, #tpu.memory_space<vmem>>, vector<16x2048xf32>
    %1 = arith.truncf %0 : vector<16x2048xf32> to vector<16x2048xbf16>
    %c0_1 = arith.constant 0 : index
    %c0_2 = arith.constant 0 : index
    %2 = vector.load %arg2[%c0_1, %c0_2] : memref<2048x512xbf16, #tpu.memory_space<vmem>>, vector<2048x512xbf16>
    %cst = arith.constant dense<0.000000e+00> : vector<16x512xf32>
    %3 = tpu.matmul %1, %2, %cst {dimension_numbers = #tpu.dot_dimension_numbers<[1], [0], [0], [1], [0, 0, 1, 1], [], []>} : vector<16x2048xbf16>, vector<2048x512xbf16>, vector<16x512xf32> -> vector<16x512xf32>
    %c0_3 = arith.constant 0 : index
    %c0_4 = arith.constant 0 : index
    %4 = vector.load %arg3[%c0_3, %c0_4] : memref<1x512xf32, #tpu.memory_space<vmem>>, vector<1x512xf32>
    %5 = vector.broadcast %4 : vector<1x512xf32> to vector<16x512xf32>
    %6 = arith.addf %3, %5 : vector<16x512xf32>
    %cst_5 = arith.constant 0.000000e+00 : f32
    %7 = vector.broadcast %cst_5 : f32 to vector<16x512xf32>
    %8 = arith.maximumf %6, %7 : vector<16x512xf32>
    %9 = arith.truncf %8 : vector<16x512xf32> to vector<16x512xbf16>
    %c0_6 = arith.constant 0 : index
    %c0_7 = arith.constant 0 : index
    %10 = vector.load %arg4[%c0_6, %c0_7] : memref<512x128xbf16, #tpu.memory_space<vmem>>, vector<512x128xbf16>
    %cst_8 = arith.constant dense<0.000000e+00> : vector<16x128xf32>
    %11 = tpu.matmul %9, %10, %cst_8 {dimension_numbers = #tpu.dot_dimension_numbers<[1], [0], [0], [1], [0, 0, 1, 1], [], []>} : vector<16x512xbf16>, vector<512x128xbf16>, vector<16x128xf32> -> vector<16x128xf32>
    %c0_9 = arith.constant 0 : index
    %c0_10 = arith.constant 0 : index
    %12 = vector.load %arg5[%c0_9, %c0_10] : memref<1x128xf32, #tpu.memory_space<vmem>>, vector<1x128xf32>
    %13 = vector.broadcast %12 : vector<1x128xf32> to vector<16x128xf32>
    %14 = arith.addf %11, %13 : vector<16x128xf32>
    %c0_11 = arith.constant 0 : index
    %c0_12 = arith.constant 0 : index
    %15 = vector.load %arg6[%c0_11, %c0_12] : memref<16x128xf32, #tpu.memory_space<vmem>>, vector<16x128xf32>
    tpu.vector_store %arg6[%c0_11, %c0_12], %14 {strides = array<i32>} : memref<16x128xf32, #tpu.memory_space<vmem>>, vector<16x128xf32>,
    return
  }
  func.func @transform_0(%arg0: i32) -> (i32, i32) {
    %c0_i32 = arith.constant 0 : i32
    %c0_i32_0 = arith.constant 0 : i32
    return %arg0, %c0_i32 : i32, i32
  }
  func.func @transform_1(%arg0: i32) -> (i32, i32) {
    %c0_i32 = arith.constant 0 : i32
    %c0_i32_0 = arith.constant 0 : i32
    %c0_i32_1 = arith.constant 0 : i32
    return %c0_i32, %c0_i32_0 : i32, i32
  }
  func.func @transform_2(%arg0: i32) -> (i32, i32) {
    %c0_i32 = arith.constant 0 : i32
    %c0_i32_0 = arith.constant 0 : i32
    %c0_i32_1 = arith.constant 0 : i32
    return %c0_i32, %c0_i32_0 : i32, i32
  }
  func.func @transform_3(%arg0: i32) -> (i32, i32) {
    %c0_i32 = arith.constant 0 : i32
    %c0_i32_0 = arith.constant 0 : i32
    %c0_i32_1 = arith.constant 0 : i32
    return %c0_i32, %c0_i32_0 : i32, i32
  }
  func.func @transform_4(%arg0: i32) -> (i32, i32) {
    %c0_i32 = arith.constant 0 : i32
    %c0_i32_0 = arith.constant 0 : i32
    %c0_i32_1 = arith.constant 0 : i32
    return %c0_i32, %c0_i32_0 : i32, i32
  }
  func.func @transform_5(%arg0: i32) -> (i32, i32) {
    %c0_i32 = arith.constant 0 : i32
    %c0_i32_0 = arith.constant 0 : i32
    return %arg0, %c0_i32 : i32, i32
  }
}

</mosaic_0001>

<bundles_post_ra>
// kernel: tpu_custom_call.1
= control target key start
LH: loop header
LB: loop body
LE: loop exit
PB: predicated region body
PF: predicated region fallthrough
CT: control target
= control target key end

     0   :  { %10 = vsyncpa [#allocation3], 0  ;;  %s6018_s0 = inlined_call_operand.hbm [shape: f32[16,2048], index: 0, kind: input, shape index: {}]   ;;  %s6019_s1 = inlined_call_operand.hbm [shape: bf16[2048,512], index: 1, kind: input, shape index: {}]   ;;  %s6020_s2 = inlined_call_operand.hbm [shape: f32[1,512], index: 2, kind: input, shape index: {}]   ;;  %s6021_s3 = inlined_call_operand.hbm [shape: bf16[512,128], index: 3, kind: input, shape index: {}]   ;;  %s6022_s4 = inlined_call_operand.hbm [shape: f32[1,128], index: 4, kind: input, shape index: {}]   ;;  %s6023_s5 = inlined_call_operand.hbm [shape: f32[16,128], index: 5, kind: output, shape index: {}]  }
   0x1   :  { %11 = vsyncpa [#allocation6], 0 }
   0x2   :  { %12 = vsyncpa [#allocation9], 0 }
   0x3   :  { %13 = vsyncpa [#allocation4], 0  ;;  %s5900_s18 = smov [#allocation5]   ;;  %s5760_s22 = scalar_lea.hbm %s6019_s1, 65536 }
   0x4   :  { %s31_s19 = sshll.u32 %s5900_s18, 4  ;;  %p5761_p0 = scmp.ne.s32.totalorder %s6019_s1, %s5760_s22  ;;  %s32_s19 = int_to_ptr.vmem [resolvable:$true] %s31_s19 }
   0x5   :  { %p5764_p1 = scmp.lt.u32.totalorder %s5760_s22, %s6019_s1 }
   0x7   :  { %p5766_p2 = pnand %p5764_p1, %p5761_p0 }
   0x9   :  { %5769 = shalt.err (!%p5766_p2)
}
   0xa   :  { %s5770_s27 = scalar_lea.vmem %s32_s19, 65536  ;;  %p5775_p4 = scmp.lt.s32.totalorder %s32_s19, %s32_s19 }
   0xb   :  { %p5771_p3 = scmp.ne.s32.totalorder %s32_s19, %s5770_s27  ;;  %p5776_p5 = scmp.lt.s32.totalorder %s5770_s27, %s5770_s27 }
   0xd   :  { %p5777_p6 = por %p5776_p5, %p5775_p4 }
   0xf   :  { %p5778_p7 = pnand %p5777_p6, %p5771_p3 }
  0x11   :  { %5781 = shalt.err (!%p5778_p7)
}
  0x12   :  { %s5901_s28 = smov 256   ;;  %s5902_s29 = smov 16  }
  0x13   :  { %37 = dma.hbm_to_vmem [thread:$0]  %s6019_s1, 65536, %s32_s19, [#allocation6], %s5901_s28, %s5901_s28, %s5902_s29  }
  0x14   :  { %s5903_s7 = smov [#allocation8]   ;;  %s5782_s11 = scalar_lea.hbm %s6021_s3, 4096 }
  0x15   :  { %s53_s8 = sshll.u32 %s5903_s7, 4  ;;  %p5783_p8 = scmp.ne.s32.totalorder %s6021_s3, %s5782_s11  ;;  %s54_s8 = int_to_ptr.vmem [resolvable:$true] %s53_s8 }
  0x16   :  { %p5786_p9 = scmp.lt.u32.totalorder %s5782_s11, %s6021_s3 }
  0x18   :  { %p5788_p10 = pnand %p5786_p9, %p5783_p8 }
  0x1a   :  { %5791 = shalt.err (!%p5788_p10)
}
  0x1b   :  { %s5792_s16 = scalar_lea.vmem %s54_s8, 4096  ;;  %p5797_p12 = scmp.lt.s32.totalorder %s54_s8, %s54_s8 }
  0x1c   :  { %p5793_p11 = scmp.ne.s32.totalorder %s54_s8, %s5792_s16  ;;  %p5798_p13 = scmp.lt.s32.totalorder %s5792_s16, %s5792_s16 }
  0x1e   :  { %p5799_p0 = por %p5798_p13, %p5797_p12 }
  0x20   :  { %p5800_p1 = pnand %p5799_p0, %p5793_p11 }
  0x22   :  { %5803 = shalt.err (!%p5800_p1)
}
  0x23   :  { %s5904_s1 = smov 64   ;;  %s5905_s17 = smov 4  }
  0x24   :  { %59 = dma.hbm_to_vmem [thread:$0]  %s6021_s3, 4096, %s54_s8, [#allocation9], %s5904_s1, %s5904_s1, %s5905_s17  }
  0x25   :  { %s5906_s20 = smov [#allocation2]   ;;  %s5804_s24 = scalar_lea.hbm %s6018_s0, 4096 }
  0x26   :  { %s19_s21 = sshll.u32 %s5906_s20, 4  ;;  %p5805_p2 = scmp.ne.s32.totalorder %s6018_s0, %s5804_s24  ;;  %s20_s21 = int_to_ptr.vmem [resolvable:$true] %s19_s21 }
  0x27   :  { %p5808_p3 = scmp.lt.u32.totalorder %s5804_s24, %s6018_s0 }
  0x29   :  { %p5810_p4 = pnand %p5808_p3, %p5805_p2 }
  0x2b   :  { %5813 = shalt.err (!%p5810_p4)
}
  0x2c   :  { %s5814_s29 = scalar_lea.vmem %s20_s21, 4096  ;;  %p5819_p6 = scmp.lt.s32.totalorder %s20_s21, %s20_s21 }
  0x2d   :  { %p5815_p5 = scmp.ne.s32.totalorder %s20_s21, %s5814_s29  ;;  %p5820_p7 = scmp.lt.s32.totalorder %s5814_s29, %s5814_s29 }
  0x2f   :  { %p5821_p8 = por %p5820_p7, %p5819_p6 }
  0x31   :  { %p5822_p9 = pnand %p5821_p8, %p5815_p5 }
  0x33   :  { %5825 = shalt.err (!%p5822_p9)
}
  0x34   :  { %s5907_s3 = smov 2048   ;;  %s5908_s30 = smov 128  }
  0x35   :  { %25 = dma.hbm_to_vmem [thread:$0]  %s6018_s0, 4096, %s20_s21, [#allocation3], %s5907_s3, %s5907_s3, %s5908_s30  }
  0x36   :  { %s5909_s8 = smov [#allocation7]   ;;  %s5910_s10 = smov [#allocation10]  }
  0x37   :  { %s44_s9 = sshll.u32 %s5909_s8, 4  ;;  %s66_s11 = sshll.u32 %s5910_s10, 4  ;;  %s45_s9 = int_to_ptr.vmem [resolvable:$true] %s44_s9  ;;  %s67_s11 = int_to_ptr.vmem [resolvable:$true] %s66_s11 }
  0x38   :  { %s5826_s14 = scalar_lea.hbm %s6020_s2, 64 }
  0x39   :  { %p5827_p10 = scmp.ne.s32.totalorder %s6020_s2, %s5826_s14  ;;  %p5830_p11 = scmp.lt.u32.totalorder %s5826_s14, %s6020_s2 }
  0x3b   :  { %p5832_p12 = pnand %p5830_p11, %p5827_p10 }
  0x3d   :  { %5835 = shalt.err (!%p5832_p12)
}
  0x3e   :  { %s5836_s0 = scalar_lea.vmem %s45_s9, 64  ;;  %p5841_p0 = scmp.lt.s32.totalorder %s45_s9, %s45_s9 }
  0x3f   :  { %p5837_p13 = scmp.ne.s32.totalorder %s45_s9, %s5836_s0  ;;  %p5842_p1 = scmp.lt.s32.totalorder %s5836_s0, %s5836_s0 }
  0x41   :  { %p5843_p2 = por %p5842_p1, %p5841_p0 }
  0x43   :  { %p5844_p3 = pnand %p5843_p2, %p5837_p13 }
  0x45   :  { %5847 = shalt.err (!%p5844_p3)
}
  0x46   :  { %47 = dma.hbm_to_vmem [thread:$0]  %s6020_s2, 64, %s45_s9, [#allocation6]  }
  0x47   :  { %s5848_s22 = scalar_lea.hbm %s6022_s4, 16 }
  0x48   :  { %p5849_p4 = scmp.ne.s32.totalorder %s6022_s4, %s5848_s22  ;;  %p5852_p5 = scmp.lt.u32.totalorder %s5848_s22, %s6022_s4 }
  0x4a   :  { %p5854_p6 = pnand %p5852_p5, %p5849_p4 }
  0x4c   :  { %5857 = shalt.err (!%p5854_p6)
}
  0x4d   :  { %s5858_s27 = scalar_lea.vmem %s67_s11, 16  ;;  %s5862_s28 = scalar_lea.vmem %s67_s11, 32 }
  0x4e   :  { %p5859_p7 = scmp.ne.s32.totalorder %s67_s11, %s5858_s27  ;;  %p5863_p8 = scmp.lt.s32.totalorder %s67_s11, %s67_s11 }
  0x4f   :  { %p5864_p9 = scmp.lt.s32.totalorder %s5862_s28, %s5858_s27 }
  0x51   :  { %p5865_p10 = por %p5864_p9, %p5863_p8 }
  0x53   :  { %p5866_p11 = pnand %p5865_p10, %p5859_p7 }
  0x55   :  { %5869 = shalt.err (!%p5866_p11)
}
  0x56   :  { %69 = dma.hbm_to_vmem [thread:$0]  %s6022_s4, 16, %s67_s11, [#allocation9]  }
  0x57   :  { %5892 = dma.done.wait [#allocation3], 4096  }
  0x58   :  { %5893 = vsyncadd [#allocation3], 4294963200 }
  0x59   :  { %5894 = dma.done.wait [#allocation6], 65600  }
  0x5a   :  { %5895 = vsyncadd [#allocation6], 4294901696 }
  0x5b   :  { %5896 = dma.done.wait [#allocation9], 4112  }
  0x5c   :  { %5897 = vsyncadd [#allocation9], 4294963184  ;;  %v4960_v0 = vld [vmem:[#allocation5 + $0x4] ss:$16 sps:$4 sm:$0xff]   ;;  %v4962_v1 = vld [vmem:[#allocation5 + $0xc] ss:$16 sps:$4 sm:$0xff]  }
  0x5d   :  { %3228 = vmatprep.subr.bf16.mxu0 %v4960_v0  ;;  %v4964_v2 = vld [vmem:[#allocation5] ss:$16 sps:$4 sm:$0xff]   ;;  %v4965_v3 = vld [vmem:[#allocation5 + $0x8] ss:$16 sps:$4 sm:$0xff]   ;;  %3572 = vmatprep.subr.bf16.mxu1 %v4962_v1  ;;  %v4966_v4 = vld [vmem:[#allocation5 + $0x24] ss:$16 sps:$4 sm:$0xff]  }
  0x5e   :  { %3229 = vmatpush1.bf16.msra.mxu0 %v4964_v2  ;;  %3573 = vmatpush1.bf16.msra.mxu1 %v4965_v3  ;;  %v4968_v5 = vld [vmem:[#allocation5 + $0x2c] ss:$16 sps:$4 sm:$0xff]   ;;  %v4970_v6 = vld [vmem:[#allocation5 + $0x20] ss:$16 sps:$4 sm:$0xff]   ;;  %v4971_v7 = vld [vmem:[#allocation5 + $0x28] ss:$16 sps:$4 sm:$0xff]  }
  0x5f   :  { %3230 = vmatprep.subr.bf16.mxu0 %v4966_v4  ;;  %3574 = vmatprep.subr.bf16.mxu1 %v4968_v5  ;;  %v4972_v8 = vld [vmem:[#allocation5 + $0x44] ss:$16 sps:$4 sm:$0xff]   ;;  %v4974_v9 = vld [vmem:[#allocation5 + $0x4c] ss:$16 sps:$4 sm:$0xff]   ;;  %v4976_v10 = vld [vmem:[#allocation5 + $0x40] ss:$16 sps:$4 sm:$0xff]  }
  0x60   :  { %v4977_v11 = vld [vmem:[#allocation5 + $0x48] ss:$16 sps:$4 sm:$0xff]   ;;  %v4978_v12 = vld [vmem:[#allocation5 + $0x64] ss:$16 sps:$4 sm:$0xff]   ;;  %v4980_v13 = vld [vmem:[#allocation5 + $0x6c] ss:$16 sps:$4 sm:$0xff]  }
  0x61   :  { %v4982_v14 = vld [vmem:[#allocation5 + $0x60] ss:$16 sps:$4 sm:$0xff]   ;;  %v4983_v15 = vld [vmem:[#allocation5 + $0x68] ss:$16 sps:$4 sm:$0xff]   ;;  %v4984_v16 = vld [vmem:[#allocation5 + $0x84] ss:$16 sps:$4 sm:$0xff]  }
  0x62   :  { %3231 = vmatpush1.bf16.msra.mxu0 %v4970_v6  ;;  %3575 = vmatpush1.bf16.msra.mxu1 %v4971_v7  ;;  %v4986_v17 = vld [vmem:[#allocation5 + $0x8c] ss:$16 sps:$4 sm:$0xff]   ;;  %v4988_v18 = vld [vmem:[#allocation5 + $0x80] ss:$16 sps:$4 sm:$0xff]   ;;  %v4989_v19 = vld [vmem:[#allocation5 + $0x88] ss:$16 sps:$4 sm:$0xff]  }
  0x63   :  { %3232 = vmatprep.subr.bf16.mxu0 %v4972_v8  ;;  %3576 = vmatprep.subr.bf16.mxu1 %v4974_v9  ;;  %v4990_v20 = vld [vmem:[#allocation5 + $0xa4] ss:$16 sps:$4 sm:$0xff]   ;;  %v4992_v21 = vld [vmem:[#allocation5 + $0xac] ss:$16 sps:$4 sm:$0xff]   ;;  %v4994_v22 = vld [vmem:[#allocation5 + $0xa0] ss:$16 sps:$4 sm:$0xff]  }
  0x64   :  { %v4995_v23 = vld [vmem:[#allocation5 + $0xa8] ss:$16 sps:$4 sm:$0xff]   ;;  %v4996_v24 = vld [vmem:[#allocation5 + $0xc4] ss:$16 sps:$4 sm:$0xff]   ;;  %v4998_v25 = vld [vmem:[#allocation5 + $0xcc] ss:$16 sps:$4 sm:$0xff]  }
  0x65   :  { %v5000_v26 = vld [vmem:[#allocation5 + $0xc0] ss:$16 sps:$4 sm:$0xff]   ;;  %v5001_v27 = vld [vmem:[#allocation5 + $0xc8] ss:$16 sps:$4 sm:$0xff]   ;;  %v5002_v28 = vld [vmem:[#allocation5 + $0xe4] ss:$16 sps:$4 sm:$0xff]  }
  0x66   :  { %3233 = vmatpush1.bf16.msra.mxu0 %v4976_v10  ;;  %3577 = vmatpush1.bf16.msra.mxu1 %v4977_v11  ;;  %v5004_v29 = vld [vmem:[#allocation5 + $0xec] ss:$16 sps:$4 sm:$0xff]   ;;  %v5006_v30 = vld [vmem:[#allocation5 + $0xe0] ss:$16 sps:$4 sm:$0xff]   ;;  %v5007_v31 = vld [vmem:[#allocation5 + $0xe8] ss:$16 sps:$4 sm:$0xff]  }
  0x67   :  { %3234 = vmatprep.subr.bf16.mxu0 %v4978_v12  ;;  %3578 = vmatprep.subr.bf16.mxu1 %v4980_v13  ;;  %v5008_v32 = vld [vmem:[#allocation5 + $0x104] ss:$16 sps:$4 sm:$0xff]   ;;  %v5010_v33 = vld [vmem:[#allocation5 + $0x10c] ss:$16 sps:$4 sm:$0xff]   ;;  %v5012_v34 = vld [vmem:[#allocation5 + $0x100] ss:$16 sps:$4 sm:$0xff]  }
  0x68   :  { %v5013_v35 = vld [vmem:[#allocation5 + $0x108] ss:$16 sps:$4 sm:$0xff]   ;;  %v5014_v36 = vld [vmem:[#allocation5 + $0x124] ss:$16 sps:$4 sm:$0xff]   ;;  %v5016_v37 = vld [vmem:[#allocation5 + $0x12c] ss:$16 sps:$4 sm:$0xff]  }
  0x69   :  { %v5018_v38 = vld [vmem:[#allocation5 + $0x120] ss:$16 sps:$4 sm:$0xff]   ;;  %v5019_v39 = vld [vmem:[#allocation5 + $0x128] ss:$16 sps:$4 sm:$0xff]   ;;  %v5020_v40 = vld [vmem:[#allocation5 + $0x144] ss:$16 sps:$4 sm:$0xff]  }
  0x6a   :  { %3235 = vmatpush1.bf16.msra.mxu0 %v4982_v14  ;;  %3579 = vmatpush1.bf16.msra.mxu1 %v4983_v15  ;;  %v5022_v41 = vld [vmem:[#allocation5 + $0x14c] ss:$16 sps:$4 sm:$0xff]   ;;  %v5024_v42 = vld [vmem:[#allocation5 + $0x140] ss:$16 sps:$4 sm:$0xff]   ;;  %v5025_v43 = vld [vmem:[#allocation5 + $0x148] ss:$16 sps:$4 sm:$0xff]  }
  0x6b   :  { %3236 = vmatprep.subr.bf16.mxu0 %v4984_v16  ;;  %3580 = vmatprep.subr.bf16.mxu1 %v4986_v17  ;;  %v5026_v44 = vld [vmem:[#allocation5 + $0x164] ss:$16 sps:$4 sm:$0xff]   ;;  %v5028_v45 = vld [vmem:[#allocation5 + $0x16c] ss:$16 sps:$4 sm:$0xff]   ;;  %v5030_v48 = vld [vmem:[#allocation5 + $0x160] ss:$16 sps:$4 sm:$0xff]  }
  0x6c   :  { %v87_v46 = vld [vmem:[#allocation2 + $0x8] sm:$0xff]  ;;  %v5032_v51 = vld [vmem:[#allocation5 + $0x184] ss:$16 sps:$4 sm:$0xff]   ;;  %v5036_v53 = vld [vmem:[#allocation5 + $0x180] ss:$16 sps:$4 sm:$0xff]   ;;  %s5911_s4 = smov [#allocation11]  }
  0x6d   :  { %v103_v47 = vld [vmem:[#allocation2 + $0x88] sm:$0xff]  ;;  %v5038_v55 = vld [vmem:[#allocation5 + $0x1a4] ss:$16 sps:$4 sm:$0xff]   ;;  %v5042_v57 = vld [vmem:[#allocation5 + $0x1a0] ss:$16 sps:$4 sm:$0xff]   ;;  %s4280_s3 = sshll.u32 %s5911_s4, 4  ;;  %s4281_s3 = int_to_ptr.vmem [resolvable:$true] %s4280_s3 }
  0x6e   :  { %3237 = vmatpush1.bf16.msra.mxu0 %v4988_v18  ;;  %3581 = vmatpush1.bf16.msra.mxu1 %v4989_v19  ;;  %v5031_v49 = vld [vmem:[#allocation5 + $0x168] ss:$16 sps:$4 sm:$0xff]   ;;  %v119_v50 = vpack.c.bf16 %v103_v47, %v87_v46  ;;  %v5034_v52 = vld [vmem:[#allocation5 + $0x18c] ss:$16 sps:$4 sm:$0xff]   ;;  %v5044_v59 = vld [vmem:[#allocation5 + $0x1c4] ss:$16 sps:$4 sm:$0xff]   ;;  %p5875_p13 = scmp.lt.s32.totalorder %s4281_s3, %s4281_s3 }
  0x6f   :  { %3238 = vmatprep.subr.bf16.mxu0 %v4990_v20  ;;  %3582 = vmatprep.subr.bf16.mxu1 %v4992_v21  ;;  %v5037_v54 = vld [vmem:[#allocation5 + $0x188] ss:$16 sps:$4 sm:$0xff]   ;;  %v5040_v56 = vld [vmem:[#allocation5 + $0x1ac] ss:$16 sps:$4 sm:$0xff]   ;;  %v5048_v61 = vld [vmem:[#allocation5 + $0x1c0] ss:$16 sps:$4 sm:$0xff]  }
  0x70   :  { %3260 = vmatprep.mubr.bf16.mxu0 %v119_v50  ;;  %3604 = vmatprep.mubr.bf16.mxu1 %v119_v50  ;;  %v5043_v58 = vld [vmem:[#allocation5 + $0x1a8] ss:$16 sps:$4 sm:$0xff]   ;;  %v5046_v60 = vld [vmem:[#allocation5 + $0x1cc] ss:$16 sps:$4 sm:$0xff]   ;;  %v5050_v63 = vld [vmem:[#allocation5 + $0x1e4] ss:$16 sps:$4 sm:$0xff]  }
  0x71   :  { %v5049_v62 = vld [vmem:[#allocation5 + $0x1c8] ss:$16 sps:$4 sm:$0xff]   ;;  %v5052_v0 = vld [vmem:[#allocation5 + $0x1ec] ss:$16 sps:$4 sm:$0xff]   ;;  %v5054_v1 = vld [vmem:[#allocation5 + $0x1e0] ss:$16 sps:$4 sm:$0xff]  }
  0x72   :  { %3239 = vmatpush1.bf16.msra.mxu0 %v4994_v22  ;;  %3583 = vmatpush1.bf16.msra.mxu1 %v4995_v23  ;;  %v5055_v2 = vld [vmem:[#allocation5 + $0x1e8] ss:$16 sps:$4 sm:$0xff]   ;;  %v5058_v3 = vld [vmem:[#allocation5 + $0x204] ss:$16 sps:$4 sm:$0xff]   ;;  %v5061_v6 = vld [vmem:[#allocation5 + $0x20c] ss:$16 sps:$4 sm:$0xff]  }
  0x73   :  { %3240 = vmatprep.subr.bf16.mxu0 %v4996_v24  ;;  %3584 = vmatprep.subr.bf16.mxu1 %v4998_v25  ;;  %v86_v4 = vld [vmem:[#allocation2] sm:$0xff]  ;;  %v5059_v8 = vld [vmem:[#allocation5 + $0x208] ss:$16 sps:$4 sm:$0xff]   ;;  %v5067_v11 = vld [vmem:[#allocation5 + $0x22c] ss:$16 sps:$4 sm:$0xff]   ;;  %s5870_s6 = scalar_lea.vmem %s4281_s3, 256 }
  0x74   :  { %v102_v5 = vld [vmem:[#allocation2 + $0x80] sm:$0xff]  ;;  %v5065_v13 = vld [vmem:[#allocation5 + $0x228] ss:$16 sps:$4 sm:$0xff]   ;;  %v5073_v15 = vld [vmem:[#allocation5 + $0x24c] ss:$16 sps:$4 sm:$0xff]   ;;  %p5871_p12 = scmp.ne.s32.totalorder %s4281_s3, %s5870_s6  ;;  %p5876_p0 = scmp.lt.s32.totalorder %s5870_s6, %s5870_s6 }
  0x75   :  { %v5056_v7 = vld [vmem:[#allocation5 + $0x200] ss:$16 sps:$4 sm:$0xff]   ;;  %v118_v9 = vpack.c.bf16 %v102_v5, %v86_v4  ;;  %v5064_v10 = vld [vmem:[#allocation5 + $0x224] ss:$16 sps:$4 sm:$0xff]   ;;  %v5071_v17 = vld [vmem:[#allocation5 + $0x248] ss:$16 sps:$4 sm:$0xff]  }
  0x76   :  { %3241 = vmatpush1.bf16.msra.mxu0 %v5000_v26  ;;  %3585 = vmatpush1.bf16.msra.mxu1 %v5001_v27  ;;  %v5062_v12 = vld [vmem:[#allocation5 + $0x220] ss:$16 sps:$4 sm:$0xff]   ;;  %v5070_v14 = vld [vmem:[#allocation5 + $0x244] ss:$16 sps:$4 sm:$0xff]   ;;  %v5079_v19 = vld [vmem:[#allocation5 + $0x26c] ss:$16 sps:$4 sm:$0xff]   ;;  %p5877_p1 = por %p5876_p0, %p5875_p13 }
  0x77   :  { %3242 = vmatprep.subr.bf16.mxu0 %v5002_v28  ;;  %3586 = vmatprep.subr.bf16.mxu1 %v5004_v29  ;;  %v5068_v16 = vld [vmem:[#allocation5 + $0x240] ss:$16 sps:$4 sm:$0xff]   ;;  %v5076_v18 = vld [vmem:[#allocation5 + $0x264] ss:$16 sps:$4 sm:$0xff]   ;;  %v5077_v21 = vld [vmem:[#allocation5 + $0x268] ss:$16 sps:$4 sm:$0xff]  }
  0x78   :  { %v5074_v20 = vld [vmem:[#allocation5 + $0x260] ss:$16 sps:$4 sm:$0xff]   ;;  %v5082_v22 = vld [vmem:[#allocation5 + $0x284] ss:$16 sps:$4 sm:$0xff]   ;;  %v5085_v23 = vld [vmem:[#allocation5 + $0x28c] ss:$16 sps:$4 sm:$0xff]   ;;  %p5878_p2 = pnand %p5877_p1, %p5871_p12 }
  0x79   :  { %v5080_v24 = vld [vmem:[#allocation5 + $0x280] ss:$16 sps:$4 sm:$0xff]   ;;  %v5083_v25 = vld [vmem:[#allocation5 + $0x288] ss:$16 sps:$4 sm:$0xff]   ;;  %v5088_v26 = vld [vmem:[#allocation5 + $0x2a4] ss:$16 sps:$4 sm:$0xff]  }
  0x7a   :  { %3243 = vmatpush1.bf16.msra.mxu0 %v5006_v30  ;;  %3587 = vmatpush1.bf16.msra.mxu1 %v5007_v31  ;;  %v5091_v27 = vld [vmem:[#allocation5 + $0x2ac] ss:$16 sps:$4 sm:$0xff]   ;;  %v5086_v28 = vld [vmem:[#allocation5 + $0x2a0] ss:$16 sps:$4 sm:$0xff]   ;;  %v5089_v29 = vld [vmem:[#allocation5 + $0x2a8] ss:$16 sps:$4 sm:$0xff]  }
  0x7b   :  { %3244 = vmatprep.subr.bf16.mxu0 %v5008_v32  ;;  %3588 = vmatprep.subr.bf16.mxu1 %v5010_v33  ;;  %v5094_v30 = vld [vmem:[#allocation5 + $0x2c4] ss:$16 sps:$4 sm:$0xff]   ;;  %v5097_v31 = vld [vmem:[#allocation5 + $0x2cc] ss:$16 sps:$4 sm:$0xff]   ;;  %v5110_v47 = vld [vmem:[#allocation5 + $0x320] ss:$16 sps:$4 sm:$0xff]  }
  0x7c   :  { %v89_v32 = vld [vmem:[#allocation2 + $0x18] sm:$0xff]  ;;  %v5148_v5 = vld [vmem:[#allocation5 + $0x3e4] ss:$16 sps:$4 sm:$0xff]  }
  0x7d   :  { %v105_v33 = vld [vmem:[#allocation2 + $0x98] sm:$0xff] }
  0x7e   :  { %3245 = vmatpush1.bf16.msra.mxu0 %v5012_v34  ;;  %3589 = vmatpush1.bf16.msra.mxu1 %v5013_v35  ;;  %v5092_v34 = vld [vmem:[#allocation5 + $0x2c0] ss:$16 sps:$4 sm:$0xff]   ;;  %v5095_v35 = vld [vmem:[#allocation5 + $0x2c8] ss:$16 sps:$4 sm:$0xff]   ;;  %v5115_v46 = vld [vmem:[#allocation5 + $0x32c] ss:$16 sps:$4 sm:$0xff]  }
  0x7f   :  { %3246 = vmatprep.subr.bf16.mxu0 %v5014_v36  ;;  %3590 = vmatprep.subr.bf16.mxu1 %v5016_v37  ;;  %v121_v36 = vpack.c.bf16 %v105_v33, %v89_v32  ;;  %v5100_v37 = vld [vmem:[#allocation5 + $0x2e4] ss:$16 sps:$4 sm:$0xff]   ;;  %v5121_v50 = vld [vmem:[#allocation5 + $0x34c] ss:$16 sps:$4 sm:$0xff]   ;;  %v5143_v4 = vld [vmem:[#allocation5 + $0x3c8] ss:$16 sps:$4 sm:$0xff]  }
  0x80   :  { %v5181_v32 = vld [vmem:[#allocation5 + $0x48c] ss:$16 sps:$4 sm:$0xff]   ;;  %v5176_v33 = vld [vmem:[#allocation5 + $0x480] ss:$16 sps:$4 sm:$0xff]  }
  0x82   :  { %3247 = vmatpush1.bf16.msra.mxu0 %v5018_v38  ;;  %3591 = vmatpush1.bf16.msra.mxu1 %v5019_v39  ;;  %v5103_v38 = vld [vmem:[#allocation5 + $0x2ec] ss:$16 sps:$4 sm:$0xff]   ;;  %v5098_v39 = vld [vmem:[#allocation5 + $0x2e0] ss:$16 sps:$4 sm:$0xff]  }
  0x83   :  { %3248 = vmatprep.subr.bf16.mxu0 %v5020_v40  ;;  %3592 = vmatprep.subr.bf16.mxu1 %v5022_v41  ;;  %v5101_v40 = vld [vmem:[#allocation5 + $0x2e8] ss:$16 sps:$4 sm:$0xff]   ;;  %v5106_v41 = vld [vmem:[#allocation5 + $0x304] ss:$16 sps:$4 sm:$0xff]  }
  0x86   :  { %3249 = vmatpush1.bf16.msra.mxu0 %v5024_v42  ;;  %3593 = vmatpush1.bf16.msra.mxu1 %v5025_v43  ;;  %v5109_v42 = vld [vmem:[#allocation5 + $0x30c] ss:$16 sps:$4 sm:$0xff]   ;;  %v5104_v43 = vld [vmem:[#allocation5 + $0x300] ss:$16 sps:$4 sm:$0xff]  }
  0x87   :  { %3250 = vmatprep.subr.bf16.mxu0 %v5026_v44  ;;  %3594 = vmatprep.subr.bf16.mxu1 %v5028_v45  ;;  %v5107_v44 = vld [vmem:[#allocation5 + $0x308] ss:$16 sps:$4 sm:$0xff]   ;;  %v5112_v45 = vld [vmem:[#allocation5 + $0x324] ss:$16 sps:$4 sm:$0xff]  }
  0x8a   :  { %3251 = vmatpush1.bf16.msra.mxu0 %v5030_v48  ;;  %3595 = vmatpush1.bf16.msra.mxu1 %v5031_v49  ;;  %v5113_v48 = vld [vmem:[#allocation5 + $0x328] ss:$16 sps:$4 sm:$0xff]   ;;  %v5118_v49 = vld [vmem:[#allocation5 + $0x344] ss:$16 sps:$4 sm:$0xff]  }
  0x8b   :  { %3252 = vmatprep.subr.bf16.mxu0 %v5032_v51  ;;  %3596 = vmatprep.subr.bf16.mxu1 %v5034_v52  ;;  %v5116_v51 = vld [vmem:[#allocation5 + $0x340] ss:$16 sps:$4 sm:$0xff]   ;;  %v5119_v52 = vld [vmem:[#allocation5 + $0x348] ss:$16 sps:$4 sm:$0xff]  }
  0x8e   :  { %3253 = vmatpush1.bf16.msra.mxu0 %v5036_v53  ;;  %3597 = vmatpush1.bf16.msra.mxu1 %v5037_v54  ;;  %v5124_v53 = vld [vmem:[#allocation5 + $0x364] ss:$16 sps:$4 sm:$0xff]   ;;  %v5127_v54 = vld [vmem:[#allocation5 + $0x36c] ss:$16 sps:$4 sm:$0xff]  }
  0x8f   :  { %3254 = vmatprep.subr.bf16.mxu0 %v5038_v55  ;;  %3598 = vmatprep.subr.bf16.mxu1 %v5040_v56  ;;  %v5122_v55 = vld [vmem:[#allocation5 + $0x360] ss:$16 sps:$4 sm:$0xff]   ;;  %v5125_v56 = vld [vmem:[#allocation5 + $0x368] ss:$16 sps:$4 sm:$0xff]  }
  0x92   :  { %3255 = vmatpush1.bf16.msra.mxu0 %v5042_v57  ;;  %3599 = vmatpush1.bf16.msra.mxu1 %v5043_v58  ;;  %v5130_v57 = vld [vmem:[#allocation5 + $0x384] ss:$16 sps:$4 sm:$0xff]   ;;  %v5133_v58 = vld [vmem:[#allocation5 + $0x38c] ss:$16 sps:$4 sm:$0xff]  }
  0x93   :  { %3256 = vmatprep.subr.bf16.mxu0 %v5044_v59  ;;  %3600 = vmatprep.subr.bf16.mxu1 %v5046_v60  ;;  %v5128_v59 = vld [vmem:[#allocation5 + $0x380] ss:$16 sps:$4 sm:$0xff]   ;;  %v5131_v60 = vld [vmem:[#allocation5 + $0x388] ss:$16 sps:$4 sm:$0xff]  }
  0x96   :  { %3257 = vmatpush1.bf16.msra.mxu0 %v5048_v61  ;;  %3601 = vmatpush1.bf16.msra.mxu1 %v5049_v62  ;;  %v5136_v61 = vld [vmem:[#allocation5 + $0x3a4] ss:$16 sps:$4 sm:$0xff]   ;;  %v5139_v62 = vld [vmem:[#allocation5 + $0x3ac] ss:$16 sps:$4 sm:$0xff]  }
  0x97   :  { %3258 = vmatprep.subr.bf16.mxu0 %v5050_v63  ;;  %3602 = vmatprep.subr.bf16.mxu1 %v5052_v0  ;;  %v5134_v63 = vld [vmem:[#allocation5 + $0x3a0] ss:$16 sps:$4 sm:$0xff]   ;;  %v5137_v0 = vld [vmem:[#allocation5 + $0x3a8] ss:$16 sps:$4 sm:$0xff]  }
  0x9a   :  { %3259 = vmatpush1.bf16.msra.mxu0 %v5054_v1  ;;  %3603 = vmatpush1.bf16.msra.mxu1 %v5055_v2  ;;  %v5142_v1 = vld [vmem:[#allocation5 + $0x3c4] ss:$16 sps:$4 sm:$0xff]   ;;  %v5145_v2 = vld [vmem:[#allocation5 + $0x3cc] ss:$16 sps:$4 sm:$0xff]  }
  0x9b   :  { %3271 = vmatprep.subr.bf16.mxu0 %v5058_v3  ;;  %3615 = vmatprep.subr.bf16.mxu1 %v5061_v6  ;;  %v5140_v3 = vld [vmem:[#allocation5 + $0x3c0] ss:$16 sps:$4 sm:$0xff]   ;;  %v5151_v6 = vld [vmem:[#allocation5 + $0x3ec] ss:$16 sps:$4 sm:$0xff]  }
  0x9d   :  { %3261 = vmatmul.mubr.bf16.vlgmr.msra.gmra.mrb[0].mxu0 %v118_v9  ;;  %3605 = vmatmul.mubr.bf16.vlgmr.msra.gmra.mrb[0].mxu1 %v118_v9  ;;  %v5154_v9 = vld [vmem:[#allocation5 + $0x404] ss:$16 sps:$4 sm:$0xff]  }
  0x9e   :  { %3272 = vmatpush1.bf16.msra.mxu0 %v5056_v7  ;;  %3616 = vmatpush1.bf16.msra.mxu1 %v5059_v8  ;;  %v5146_v7 = vld [vmem:[#allocation5 + $0x3e0] ss:$16 sps:$4 sm:$0xff]   ;;  %v5149_v8 = vld [vmem:[#allocation5 + $0x3e8] ss:$16 sps:$4 sm:$0xff]  }
  0x9f   :  { %3273 = vmatprep.subr.bf16.mxu0 %v5064_v10  ;;  %3617 = vmatprep.subr.bf16.mxu1 %v5067_v11  ;;  %v88_v10 = vld [vmem:[#allocation2 + $0x10] sm:$0xff] }
  0xa0   :  { %3303 = vmatprep.mubr.bf16.mxu0 %v121_v36  ;;  %3647 = vmatprep.mubr.bf16.mxu1 %v121_v36  ;;  %v104_v11 = vld [vmem:[#allocation2 + $0x90] sm:$0xff]  ;;  %v5187_v36 = vld [vmem:[#allocation5 + $0x4ac] ss:$16 sps:$4 sm:$0xff]  }
  0xa2   :  { %3274 = vmatpush1.bf16.msra.mxu0 %v5062_v12  ;;  %3618 = vmatpush1.bf16.msra.mxu1 %v5065_v13  ;;  %v5157_v12 = vld [vmem:[#allocation5 + $0x40c] ss:$16 sps:$4 sm:$0xff]   ;;  %v5152_v13 = vld [vmem:[#allocation5 + $0x400] ss:$16 sps:$4 sm:$0xff]  }
  0xa3   :  { %3275 = vmatprep.subr.bf16.mxu0 %v5070_v14  ;;  %3619 = vmatprep.subr.bf16.mxu1 %v5073_v15  ;;  %v5155_v14 = vld [vmem:[#allocation5 + $0x408] ss:$16 sps:$4 sm:$0xff]   ;;  %v120_v15 = vpack.c.bf16 %v104_v11, %v88_v10  ;;  %v5244_v11 = vld [vmem:[#allocation5 + $0x5e4] ss:$16 sps:$4 sm:$0xff]  }
  0xa4   :  { %v5239_v10 = vld [vmem:[#allocation5 + $0x5c8] ss:$16 sps:$4 sm:$0xff]  }
  0xa6   :  { %3276 = vmatpush1.bf16.msra.mxu0 %v5068_v16  ;;  %3620 = vmatpush1.bf16.msra.mxu1 %v5071_v17  ;;  %v5160_v16 = vld [vmem:[#allocation5 + $0x424] ss:$16 sps:$4 sm:$0xff]   ;;  %v5163_v17 = vld [vmem:[#allocation5 + $0x42c] ss:$16 sps:$4 sm:$0xff]  }
  0xa7   :  { %3277 = vmatprep.subr.bf16.mxu0 %v5076_v18  ;;  %3621 = vmatprep.subr.bf16.mxu1 %v5079_v19  ;;  %v91_v18 = vld [vmem:[#allocation2 + $0x28] sm:$0xff] }
  0xa8   :  { %v107_v19 = vld [vmem:[#allocation2 + $0xa8] sm:$0xff] }
  0xaa   :  { %3278 = vmatpush1.bf16.msra.mxu0 %v5074_v20  ;;  %3622 = vmatpush1.bf16.msra.mxu1 %v5077_v21  ;;  %v5158_v20 = vld [vmem:[#allocation5 + $0x420] ss:$16 sps:$4 sm:$0xff]   ;;  %v5161_v21 = vld [vmem:[#allocation5 + $0x428] ss:$16 sps:$4 sm:$0xff]  }
  0xab   :  { %3279 = vmatprep.subr.bf16.mxu0 %v5082_v22  ;;  %3623 = vmatprep.subr.bf16.mxu1 %v5085_v23  ;;  %v123_v22 = vpack.c.bf16 %v107_v19, %v91_v18  ;;  %v5166_v23 = vld [vmem:[#allocation5 + $0x444] ss:$16 sps:$4 sm:$0xff]   ;;  %v5253_v18 = vld [vmem:[#allocation5 + $0x60c] ss:$16 sps:$4 sm:$0xff]   ;;  %v5248_v19 = vld [vmem:[#allocation5 + $0x600] ss:$16 sps:$4 sm:$0xff]  }
  0xae   :  { %3280 = vmatpush1.bf16.msra.mxu0 %v5080_v24  ;;  %3624 = vmatpush1.bf16.msra.mxu1 %v5083_v25  ;;  %v5169_v24 = vld [vmem:[#allocation5 + $0x44c] ss:$16 sps:$4 sm:$0xff]   ;;  %v5164_v25 = vld [vmem:[#allocation5 + $0x440] ss:$16 sps:$4 sm:$0xff]  }
  0xaf   :  { %3281 = vmatprep.subr.bf16.mxu0 %v5088_v26  ;;  %3625 = vmatprep.subr.bf16.mxu1 %v5091_v27  ;;  %v5167_v26 = vld [vmem:[#allocation5 + $0x448] ss:$16 sps:$4 sm:$0xff]   ;;  %v5172_v27 = vld [vmem:[#allocation5 + $0x464] ss:$16 sps:$4 sm:$0xff]  }
  0xb2   :  { %3282 = vmatpush1.bf16.msra.mxu0 %v5086_v28  ;;  %3626 = vmatpush1.bf16.msra.mxu1 %v5089_v29  ;;  %v5175_v28 = vld [vmem:[#allocation5 + $0x46c] ss:$16 sps:$4 sm:$0xff]   ;;  %v5170_v29 = vld [vmem:[#allocation5 + $0x460] ss:$16 sps:$4 sm:$0xff]  }
  0xb3   :  { %3283 = vmatprep.subr.bf16.mxu0 %v5094_v30  ;;  %3627 = vmatprep.subr.bf16.mxu1 %v5097_v31  ;;  %v5173_v30 = vld [vmem:[#allocation5 + $0x468] ss:$16 sps:$4 sm:$0xff]   ;;  %v5178_v31 = vld [vmem:[#allocation5 + $0x484] ss:$16 sps:$4 sm:$0xff]  }
  0xb6   :  { %3284 = vmatpush1.bf16.msra.mxu0 %v5092_v34  ;;  %3628 = vmatpush1.bf16.msra.mxu1 %v5095_v35  ;;  %v5179_v34 = vld [vmem:[#allocation5 + $0x488] ss:$16 sps:$4 sm:$0xff]   ;;  %v5184_v35 = vld [vmem:[#allocation5 + $0x4a4] ss:$16 sps:$4 sm:$0xff]  }
  0xb7   :  { %3285 = vmatprep.subr.bf16.mxu0 %v5100_v37  ;;  %3629 = vmatprep.subr.bf16.mxu1 %v5103_v38  ;;  %v5182_v37 = vld [vmem:[#allocation5 + $0x4a0] ss:$16 sps:$4 sm:$0xff]   ;;  %v5185_v38 = vld [vmem:[#allocation5 + $0x4a8] ss:$16 sps:$4 sm:$0xff]  }
  0xba   :  { %3286 = vmatpush1.bf16.msra.mxu0 %v5098_v39  ;;  %3630 = vmatpush1.bf16.msra.mxu1 %v5101_v40  ;;  %v5190_v39 = vld [vmem:[#allocation5 + $0x4c4] ss:$16 sps:$4 sm:$0xff]   ;;  %v5193_v40 = vld [vmem:[#allocation5 + $0x4cc] ss:$16 sps:$4 sm:$0xff]  }
  0xbb   :  { %3287 = vmatprep.subr.bf16.mxu0 %v5106_v41  ;;  %3631 = vmatprep.subr.bf16.mxu1 %v5109_v42  ;;  %v5188_v41 = vld [vmem:[#allocation5 + $0x4c0] ss:$16 sps:$4 sm:$0xff]   ;;  %v5191_v42 = vld [vmem:[#allocation5 + $0x4c8] ss:$16 sps:$4 sm:$0xff]  }
  0xbe   :  { %3288 = vmatpush1.bf16.msra.mxu0 %v5104_v43  ;;  %3632 = vmatpush1.bf16.msra.mxu1 %v5107_v44  ;;  %v5196_v43 = vld [vmem:[#allocation5 + $0x4e4] ss:$16 sps:$4 sm:$0xff]   ;;  %v5199_v44 = vld [vmem:[#allocation5 + $0x4ec] ss:$16 sps:$4 sm:$0xff]  }
  0xbf   :  { %3289 = vmatprep.subr.bf16.mxu0 %v5112_v45  ;;  %3633 = vmatprep.subr.bf16.mxu1 %v5115_v46  ;;  %v5194_v45 = vld [vmem:[#allocation5 + $0x4e0] ss:$16 sps:$4 sm:$0xff]   ;;  %v5197_v46 = vld [vmem:[#allocation5 + $0x4e8] ss:$16 sps:$4 sm:$0xff]  }
  0xc2   :  { %3290 = vmatpush1.bf16.msra.mxu0 %v5110_v47  ;;  %3634 = vmatpush1.bf16.msra.mxu1 %v5113_v48  ;;  %v5202_v47 = vld [vmem:[#allocation5 + $0x504] ss:$16 sps:$4 sm:$0xff]   ;;  %v5205_v48 = vld [vmem:[#allocation5 + $0x50c] ss:$16 sps:$4 sm:$0xff]  }
  0xc3   :  { %3291 = vmatprep.subr.bf16.mxu0 %v5118_v49  ;;  %3635 = vmatprep.subr.bf16.mxu1 %v5121_v50  ;;  %v5200_v49 = vld [vmem:[#allocation5 + $0x500] ss:$16 sps:$4 sm:$0xff]   ;;  %v5203_v50 = vld [vmem:[#allocation5 + $0x508] ss:$16 sps:$4 sm:$0xff]  }
  0xc6   :  { %3292 = vmatpush1.bf16.msra.mxu0 %v5116_v51  ;;  %3636 = vmatpush1.bf16.msra.mxu1 %v5119_v52  ;;  %v5208_v51 = vld [vmem:[#allocation5 + $0x524] ss:$16 sps:$4 sm:$0xff]   ;;  %v5211_v52 = vld [vmem:[#allocation5 + $0x52c] ss:$16 sps:$4 sm:$0xff]  }
  0xc7   :  { %3293 = vmatprep.subr.bf16.mxu0 %v5124_v53  ;;  %3637 = vmatprep.subr.bf16.mxu1 %v5127_v54  ;;  %v5206_v53 = vld [vmem:[#allocation5 + $0x520] ss:$16 sps:$4 sm:$0xff]   ;;  %v5209_v54 = vld [vmem:[#allocation5 + $0x528] ss:$16 sps:$4 sm:$0xff]  }
  0xca   :  { %3294 = vmatpush1.bf16.msra.mxu0 %v5122_v55  ;;  %3638 = vmatpush1.bf16.msra.mxu1 %v5125_v56  ;;  %v5214_v55 = vld [vmem:[#allocation5 + $0x544] ss:$16 sps:$4 sm:$0xff]   ;;  %v5217_v56 = vld [vmem:[#allocation5 + $0x54c] ss:$16 sps:$4 sm:$0xff]  }
  0xcb   :  { %3295 = vmatprep.subr.bf16.mxu0 %v5130_v57  ;;  %3639 = vmatprep.subr.bf16.mxu1 %v5133_v58  ;;  %v5212_v57 = vld [vmem:[#allocation5 + $0x540] ss:$16 sps:$4 sm:$0xff]   ;;  %v5215_v58 = vld [vmem:[#allocation5 + $0x548] ss:$16 sps:$4 sm:$0xff]  }
  0xce   :  { %3296 = vmatpush1.bf16.msra.mxu0 %v5128_v59  ;;  %3640 = vmatpush1.bf16.msra.mxu1 %v5131_v60  ;;  %v5220_v59 = vld [vmem:[#allocation5 + $0x564] ss:$16 sps:$4 sm:$0xff]   ;;  %v5223_v60 = vld [vmem:[#allocation5 + $0x56c] ss:$16 sps:$4 sm:$0xff]  }
  0xcf   :  { %3297 = vmatprep.subr.bf16.mxu0 %v5136_v61  ;;  %3641 = vmatprep.subr.bf16.mxu1 %v5139_v62  ;;  %v5218_v61 = vld [vmem:[#allocation5 + $0x560] ss:$16 sps:$4 sm:$0xff]   ;;  %v5221_v62 = vld [vmem:[#allocation5 + $0x568] ss:$16 sps:$4 sm:$0xff]  }
  0xd2   :  { %3298 = vmatpush1.bf16.msra.mxu0 %v5134_v63  ;;  %3642 = vmatpush1.bf16.msra.mxu1 %v5137_v0  ;;  %v5226_v63 = vld [vmem:[#allocation5 + $0x584] ss:$16 sps:$4 sm:$0xff]   ;;  %v5229_v0 = vld [vmem:[#allocation5 + $0x58c] ss:$16 sps:$4 sm:$0xff]  }
  0xd3   :  { %3299 = vmatprep.subr.bf16.mxu0 %v5142_v1  ;;  %3643 = vmatprep.subr.bf16.mxu1 %v5145_v2  ;;  %v5224_v1 = vld [vmem:[#allocation5 + $0x580] ss:$16 sps:$4 sm:$0xff]   ;;  %v5227_v2 = vld [vmem:[#allocation5 + $0x588] ss:$16 sps:$4 sm:$0xff]  }
  0xd6   :  { %3300 = vmatpush1.bf16.msra.mxu0 %v5140_v3  ;;  %3644 = vmatpush1.bf16.msra.mxu1 %v5143_v4  ;;  %v5232_v3 = vld [vmem:[#allocation5 + $0x5a4] ss:$16 sps:$4 sm:$0xff]   ;;  %v5235_v4 = vld [vmem:[#allocation5 + $0x5ac] ss:$16 sps:$4 sm:$0xff]  }
  0xd7   :  { %3301 = vmatprep.subr.bf16.mxu0 %v5148_v5  ;;  %3645 = vmatprep.subr.bf16.mxu1 %v5151_v6  ;;  %v5230_v5 = vld [vmem:[#allocation5 + $0x5a0] ss:$16 sps:$4 sm:$0xff]   ;;  %v5233_v6 = vld [vmem:[#allocation5 + $0x5a8] ss:$16 sps:$4 sm:$0xff]  }
  0xda   :  { %3302 = vmatpush1.bf16.msra.mxu0 %v5146_v7  ;;  %3646 = vmatpush1.bf16.msra.mxu1 %v5149_v8  ;;  %v5238_v7 = vld [vmem:[#allocation5 + $0x5c4] ss:$16 sps:$4 sm:$0xff]   ;;  %v5241_v8 = vld [vmem:[#allocation5 + $0x5cc] ss:$16 sps:$4 sm:$0xff]  }
  0xdb   :  { %3314 = vmatprep.subr.bf16.mxu0 %v5154_v9  ;;  %3658 = vmatprep.subr.bf16.mxu1 %v5157_v12  ;;  %v5236_v9 = vld [vmem:[#allocation5 + $0x5c0] ss:$16 sps:$4 sm:$0xff]   ;;  %v5247_v12 = vld [vmem:[#allocation5 + $0x5ec] ss:$16 sps:$4 sm:$0xff]  }
  0xdd   :  { %3304 = vmatmul.mubr.bf16.vlgmr.msra.gmra.mrb[0].mxu0 %v120_v15  ;;  %3648 = vmatmul.mubr.bf16.vlgmr.msra.gmra.mrb[0].mxu1 %v120_v15  ;;  %v5250_v15 = vld [vmem:[#allocation5 + $0x604] ss:$16 sps:$4 sm:$0xff]  }
  0xde   :  { %3315 = vmatpush1.bf16.msra.mxu0 %v5152_v13  ;;  %3659 = vmatpush1.bf16.msra.mxu1 %v5155_v14  ;;  %v5242_v13 = vld [vmem:[#allocation5 + $0x5e0] ss:$16 sps:$4 sm:$0xff]   ;;  %v5245_v14 = vld [vmem:[#allocation5 + $0x5e8] ss:$16 sps:$4 sm:$0xff]  }
  0xdf   :  { %3316 = vmatprep.subr.bf16.mxu0 %v5160_v16  ;;  %3660 = vmatprep.subr.bf16.mxu1 %v5163_v17  ;;  %v90_v16 = vld [vmem:[#allocation2 + $0x20] sm:$0xff] }
  0xe0   :  { %3346 = vmatprep.mubr.bf16.mxu0 %v123_v22  ;;  %3690 = vmatprep.mubr.bf16.mxu1 %v123_v22  ;;  %v106_v17 = vld [vmem:[#allocation2 + $0xa0] sm:$0xff]  ;;  %v93_v22 = vld [vmem:[#allocation2 + $0x38] sm:$0xff] }
  0xe2   :  { %3317 = vmatpush1.bf16.msra.mxu0 %v5158_v20  ;;  %3661 = vmatpush1.bf16.msra.mxu1 %v5161_v21  ;;  %v5251_v20 = vld [vmem:[#allocation5 + $0x608] ss:$16 sps:$4 sm:$0xff]   ;;  %v122_v21 = vpack.c.bf16 %v106_v17, %v90_v16  ;;  %v5340_v17 = vld [vmem:[#allocation5 + $0x7e4] ss:$16 sps:$4 sm:$0xff]  }
  0xe3   :  { %3318 = vmatprep.subr.bf16.mxu0 %v5166_v23  ;;  %3662 = vmatprep.subr.bf16.mxu1 %v5169_v24  ;;  %v109_v23 = vld [vmem:[#allocation2 + $0xb8] sm:$0xff]  ;;  %v5256_v24 = vld [vmem:[#allocation5 + $0x624] ss:$16 sps:$4 sm:$0xff]  }
  0xe4   :  { %v5335_v16 = vld [vmem:[#allocation5 + $0x7c8] ss:$16 sps:$4 sm:$0xff]  }
  0xe6   :  { %3319 = vmatpush1.bf16.msra.mxu0 %v5164_v25  ;;  %3663 = vmatpush1.bf16.msra.mxu1 %v5167_v26  ;;  %v5259_v25 = vld [vmem:[#allocation5 + $0x62c] ss:$16 sps:$4 sm:$0xff]   ;;  %v125_v26 = vpack.c.bf16 %v109_v23, %v93_v22  ;;  %v92_v22 = vld [vmem:[#allocation2 + $0x30] sm:$0xff] }
  0xe7   :  { %3320 = vmatprep.subr.bf16.mxu0 %v5172_v27  ;;  %3664 = vmatprep.subr.bf16.mxu1 %v5175_v28  ;;  %v5254_v27 = vld [vmem:[#allocation5 + $0x620] ss:$16 sps:$4 sm:$0xff]   ;;  %v5257_v28 = vld [vmem:[#allocation5 + $0x628] ss:$16 sps:$4 sm:$0xff]  }
  0xe8   :  { %v108_v23 = vld [vmem:[#allocation2 + $0xb0] sm:$0xff] }
  0xea   :  { %3321 = vmatpush1.bf16.msra.mxu0 %v5170_v29  ;;  %3665 = vmatpush1.bf16.msra.mxu1 %v5173_v30  ;;  %v5262_v29 = vld [vmem:[#allocation5 + $0x644] ss:$16 sps:$4 sm:$0xff]   ;;  %v5265_v30 = vld [vmem:[#allocation5 + $0x64c] ss:$16 sps:$4 sm:$0xff]  }
  0xeb   :  { %3322 = vmatprep.subr.bf16.mxu0 %v5178_v31  ;;  %3666 = vmatprep.subr.bf16.mxu1 %v5181_v32  ;;  %v5260_v31 = vld [vmem:[#allocation5 + $0x640] ss:$16 sps:$4 sm:$0xff]   ;;  %v5263_v32 = vld [vmem:[#allocation5 + $0x648] ss:$16 sps:$4 sm:$0xff]  }
  0xee   :  { %3323 = vmatpush1.bf16.msra.mxu0 %v5176_v33  ;;  %3667 = vmatpush1.bf16.msra.mxu1 %v5179_v34  ;;  %v5268_v33 = vld [vmem:[#allocation5 + $0x664] ss:$16 sps:$4 sm:$0xff]   ;;  %v5271_v34 = vld [vmem:[#allocation5 + $0x66c] ss:$16 sps:$4 sm:$0xff]  }
  0xef   :  { %3324 = vmatprep.subr.bf16.mxu0 %v5184_v35  ;;  %3668 = vmatprep.subr.bf16.mxu1 %v5187_v36  ;;  %v5266_v35 = vld [vmem:[#allocation5 + $0x660] ss:$16 sps:$4 sm:$0xff]   ;;  %v5269_v36 = vld [vmem:[#allocation5 + $0x668] ss:$16 sps:$4 sm:$0xff]  }
  0xf2   :  { %3325 = vmatpush1.bf16.msra.mxu0 %v5182_v37  ;;  %3669 = vmatpush1.bf16.msra.mxu1 %v5185_v38  ;;  %v5274_v37 = vld [vmem:[#allocation5 + $0x684] ss:$16 sps:$4 sm:$0xff]   ;;  %v5277_v38 = vld [vmem:[#allocation5 + $0x68c] ss:$16 sps:$4 sm:$0xff]  }
  0xf3   :  { %3326 = vmatprep.subr.bf16.mxu0 %v5190_v39  ;;  %3670 = vmatprep.subr.bf16.mxu1 %v5193_v40  ;;  %v5272_v39 = vld [vmem:[#allocation5 + $0x680] ss:$16 sps:$4 sm:$0xff]   ;;  %v5275_v40 = vld [vmem:[#allocation5 + $0x688] ss:$16 sps:$4 sm:$0xff]  }
  0xf6   :  { %3327 = vmatpush1.bf16.msra.mxu0 %v5188_v41  ;;  %3671 = vmatpush1.bf16.msra.mxu1 %v5191_v42  ;;  %v5280_v41 = vld [vmem:[#allocation5 + $0x6a4] ss:$16 sps:$4 sm:$0xff]   ;;  %v5283_v42 = vld [vmem:[#allocation5 + $0x6ac] ss:$16 sps:$4 sm:$0xff]  }
  0xf7   :  { %3328 = vmatprep.subr.bf16.mxu0 %v5196_v43  ;;  %3672 = vmatprep.subr.bf16.mxu1 %v5199_v44  ;;  %v5278_v43 = vld [vmem:[#allocation5 + $0x6a0] ss:$16 sps:$4 sm:$0xff]   ;;  %v5281_v44 = vld [vmem:[#allocation5 + $0x6a8] ss:$16 sps:$4 sm:$0xff]  }
  0xfa   :  { %3329 = vmatpush1.bf16.msra.mxu0 %v5194_v45  ;;  %3673 = vmatpush1.bf16.msra.mxu1 %v5197_v46  ;;  %v5286_v45 = vld [vmem:[#allocation5 + $0x6c4] ss:$16 sps:$4 sm:$0xff]   ;;  %v5289_v46 = vld [vmem:[#allocation5 + $0x6cc] ss:$16 sps:$4 sm:$0xff]  }
  0xfb   :  { %3330 = vmatprep.subr.bf16.mxu0 %v5202_v47  ;;  %3674 = vmatprep.subr.bf16.mxu1 %v5205_v48  ;;  %v5284_v47 = vld [vmem:[#allocation5 + $0x6c0] ss:$16 sps:$4 sm:$0xff]   ;;  %v5287_v48 = vld [vmem:[#allocation5 + $0x6c8] ss:$16 sps:$4 sm:$0xff]  }
  0xfe   :  { %3331 = vmatpush1.bf16.msra.mxu0 %v5200_v49  ;;  %3675 = vmatpush1.bf16.msra.mxu1 %v5203_v50  ;;  %v5292_v49 = vld [vmem:[#allocation5 + $0x6e4] ss:$16 sps:$4 sm:$0xff]   ;;  %v5295_v50 = vld [vmem:[#allocation5 + $0x6ec] ss:$16 sps:$4 sm:$0xff]  }
  0xff   :  { %3332 = vmatprep.subr.bf16.mxu0 %v5208_v51  ;;  %3676 = vmatprep.subr.bf16.mxu1 %v5211_v52  ;;  %v5290_v51 = vld [vmem:[#allocation5 + $0x6e0] ss:$16 sps:$4 sm:$0xff]   ;;  %v5293_v52 = vld [vmem:[#allocation5 + $0x6e8] ss:$16 sps:$4 sm:$0xff]  }
 0x102   :  { %3333 = vmatpush1.bf16.msra.mxu0 %v5206_v53  ;;  %3677 = vmatpush1.bf16.msra.mxu1 %v5209_v54  ;;  %v5298_v53 = vld [vmem:[#allocation5 + $0x704] ss:$16 sps:$4 sm:$0xff]   ;;  %v5301_v54 = vld [vmem:[#allocation5 + $0x70c] ss:$16 sps:$4 sm:$0xff]  }
 0x103   :  { %3334 = vmatprep.subr.bf16.mxu0 %v5214_v55  ;;  %3678 = vmatprep.subr.bf16.mxu1 %v5217_v56  ;;  %v5296_v55 = vld [vmem:[#allocation5 + $0x700] ss:$16 sps:$4 sm:$0xff]   ;;  %v5299_v56 = vld [vmem:[#allocation5 + $0x708] ss:$16 sps:$4 sm:$0xff]  }
 0x106   :  { %3335 = vmatpush1.bf16.msra.mxu0 %v5212_v57  ;;  %3679 = vmatpush1.bf16.msra.mxu1 %v5215_v58  ;;  %v5304_v57 = vld [vmem:[#allocation5 + $0x724] ss:$16 sps:$4 sm:$0xff]   ;;  %v5307_v58 = vld [vmem:[#allocation5 + $0x72c] ss:$16 sps:$4 sm:$0xff]  }
 0x107   :  { %3336 = vmatprep.subr.bf16.mxu0 %v5220_v59  ;;  %3680 = vmatprep.subr.bf16.mxu1 %v5223_v60  ;;  %v5302_v59 = vld [vmem:[#allocation5 + $0x720] ss:$16 sps:$4 sm:$0xff]   ;;  %v5305_v60 = vld [vmem:[#allocation5 + $0x728] ss:$16 sps:$4 sm:$0xff]  }
 0x10a   :  { %3337 = vmatpush1.bf16.msra.mxu0 %v5218_v61  ;;  %3681 = vmatpush1.bf16.msra.mxu1 %v5221_v62  ;;  %v5310_v61 = vld [vmem:[#allocation5 + $0x744] ss:$16 sps:$4 sm:$0xff]   ;;  %v5313_v62 = vld [vmem:[#allocation5 + $0x74c] ss:$16 sps:$4 sm:$0xff]  }
 0x10b   :  { %3338 = vmatprep.subr.bf16.mxu0 %v5226_v63  ;;  %3682 = vmatprep.subr.bf16.mxu1 %v5229_v0  ;;  %v5308_v63 = vld [vmem:[#allocation5 + $0x740] ss:$16 sps:$4 sm:$0xff]   ;;  %v5311_v0 = vld [vmem:[#allocation5 + $0x748] ss:$16 sps:$4 sm:$0xff]  }
 0x10e   :  { %3339 = vmatpush1.bf16.msra.mxu0 %v5224_v1  ;;  %3683 = vmatpush1.bf16.msra.mxu1 %v5227_v2  ;;  %v5316_v1 = vld [vmem:[#allocation5 + $0x764] ss:$16 sps:$4 sm:$0xff]   ;;  %v5319_v2 = vld [vmem:[#allocation5 + $0x76c] ss:$16 sps:$4 sm:$0xff]  }
 0x10f   :  { %3340 = vmatprep.subr.bf16.mxu0 %v5232_v3  ;;  %3684 = vmatprep.subr.bf16.mxu1 %v5235_v4  ;;  %v5314_v3 = vld [vmem:[#allocation5 + $0x760] ss:$16 sps:$4 sm:$0xff]   ;;  %v5317_v4 = vld [vmem:[#allocation5 + $0x768] ss:$16 sps:$4 sm:$0xff]  }
 0x112   :  { %3341 = vmatpush1.bf16.msra.mxu0 %v5230_v5  ;;  %3685 = vmatpush1.bf16.msra.mxu1 %v5233_v6  ;;  %v5322_v5 = vld [vmem:[#allocation5 + $0x784] ss:$16 sps:$4 sm:$0xff]   ;;  %v5325_v6 = vld [vmem:[#allocation5 + $0x78c] ss:$16 sps:$4 sm:$0xff]  }
 0x113   :  { %3342 = vmatprep.subr.bf16.mxu0 %v5238_v7  ;;  %3686 = vmatprep.subr.bf16.mxu1 %v5241_v8  ;;  %v5320_v7 = vld [vmem:[#allocation5 + $0x780] ss:$16 sps:$4 sm:$0xff]   ;;  %v5323_v8 = vld [vmem:[#allocation5 + $0x788] ss:$16 sps:$4 sm:$0xff]  }
 0x116   :  { %3343 = vmatpush1.bf16.msra.mxu0 %v5236_v9  ;;  %3687 = vmatpush1.bf16.msra.mxu1 %v5239_v10  ;;  %v5328_v9 = vld [vmem:[#allocation5 + $0x7a4] ss:$16 sps:$4 sm:$0xff]   ;;  %v5331_v10 = vld [vmem:[#allocation5 + $0x7ac] ss:$16 sps:$4 sm:$0xff]  }
 0x117   :  { %3344 = vmatprep.subr.bf16.mxu0 %v5244_v11  ;;  %3688 = vmatprep.subr.bf16.mxu1 %v5247_v12  ;;  %v5326_v11 = vld [vmem:[#allocation5 + $0x7a0] ss:$16 sps:$4 sm:$0xff]   ;;  %v5329_v12 = vld [vmem:[#allocation5 + $0x7a8] ss:$16 sps:$4 sm:$0xff]  }
 0x11a   :  { %3345 = vmatpush1.bf16.msra.mxu0 %v5242_v13  ;;  %3689 = vmatpush1.bf16.msra.mxu1 %v5245_v14  ;;  %v5334_v13 = vld [vmem:[#allocation5 + $0x7c4] ss:$16 sps:$4 sm:$0xff]   ;;  %v5337_v14 = vld [vmem:[#allocation5 + $0x7cc] ss:$16 sps:$4 sm:$0xff]  }
 0x11b   :  { %3357 = vmatprep.subr.bf16.mxu0 %v5250_v15  ;;  %3701 = vmatprep.subr.bf16.mxu1 %v5253_v18  ;;  %v5332_v15 = vld [vmem:[#allocation5 + $0x7c0] ss:$16 sps:$4 sm:$0xff]   ;;  %v5343_v18 = vld [vmem:[#allocation5 + $0x7ec] ss:$16 sps:$4 sm:$0xff]  }
 0x11d   :  { %3347 = vmatmul.mubr.bf16.vlgmr.msra.gmra.mrb[0].mxu0 %v122_v21  ;;  %3691 = vmatmul.mubr.bf16.vlgmr.msra.gmra.mrb[0].mxu1 %v122_v21  ;;  %v5346_v21 = vld [vmem:[#allocation5 + $0x804] ss:$16 sps:$4 sm:$0xff]  }
 0x11e   :  { %3358 = vmatpush1.bf16.msra.mxu0 %v5248_v19  ;;  %3702 = vmatpush1.bf16.msra.mxu1 %v5251_v20  ;;  %v5338_v19 = vld [vmem:[#allocation5 + $0x7e0] ss:$16 sps:$4 sm:$0xff]   ;;  %v5341_v20 = vld [vmem:[#allocation5 + $0x7e8] ss:$16 sps:$4 sm:$0xff]  }
 0x11f   :  { %3359 = vmatprep.subr.bf16.mxu0 %v5256_v24  ;;  %3703 = vmatprep.subr.bf16.mxu1 %v5259_v25  ;;  %v5349_v24 = vld [vmem:[#allocation5 + $0x80c] ss:$16 sps:$4 sm:$0xff]   ;;  %v5344_v25 = vld [vmem:[#allocation5 + $0x800] ss:$16 sps:$4 sm:$0xff]  }
 0x120   :  { %3389 = vmatprep.mubr.bf16.mxu0 %v125_v26  ;;  %3733 = vmatprep.mubr.bf16.mxu1 %v125_v26  ;;  %v5347_v26 = vld [vmem:[#allocation5 + $0x808] ss:$16 sps:$4 sm:$0xff]  }
 0x122   :  { %3360 = vmatpush1.bf16.msra.mxu0 %v5254_v27  ;;  %3704 = vmatpush1.bf16.msra.mxu1 %v5257_v28  ;;  %v124_v27 = vpack.c.bf16 %v108_v23, %v92_v22  ;;  %v95_v28 = vld [vmem:[#allocation2 + $0x48] sm:$0xff]  ;;  %v5436_v23 = vld [vmem:[#allocation5 + $0x9e4] ss:$16 sps:$4 sm:$0xff]  }
 0x123   :  { %3361 = vmatprep.subr.bf16.mxu0 %v5262_v29  ;;  %3705 = vmatprep.subr.bf16.mxu1 %v5265_v30  ;;  %v111_v29 = vld [vmem:[#allocation2 + $0xc8] sm:$0xff]  ;;  %v5352_v30 = vld [vmem:[#allocation5 + $0x824] ss:$16 sps:$4 sm:$0xff]  }
 0x124   :  { %v5431_v22 = vld [vmem:[#allocation5 + $0x9c8] ss:$16 sps:$4 sm:$0xff]  }
 0x126   :  { %3362 = vmatpush1.bf16.msra.mxu0 %v5260_v31  ;;  %3706 = vmatpush1.bf16.msra.mxu1 %v5263_v32  ;;  %v5355_v31 = vld [vmem:[#allocation5 + $0x82c] ss:$16 sps:$4 sm:$0xff]   ;;  %v127_v32 = vpack.c.bf16 %v111_v29, %v95_v28  ;;  %v94_v29 = vld [vmem:[#allocation2 + $0x40] sm:$0xff] }
 0x127   :  { %3363 = vmatprep.subr.bf16.mxu0 %v5268_v33  ;;  %3707 = vmatprep.subr.bf16.mxu1 %v5271_v34  ;;  %v5350_v33 = vld [vmem:[#allocation5 + $0x820] ss:$16 sps:$4 sm:$0xff]   ;;  %v5353_v34 = vld [vmem:[#allocation5 + $0x828] ss:$16 sps:$4 sm:$0xff]   ;;  %v5445_v28 = vld [vmem:[#allocation5 + $0xa0c] ss:$16 sps:$4 sm:$0xff]  }
 0x12a   :  { %3364 = vmatpush1.bf16.msra.mxu0 %v5266_v35  ;;  %3708 = vmatpush1.bf16.msra.mxu1 %v5269_v36  ;;  %v5358_v35 = vld [vmem:[#allocation5 + $0x844] ss:$16 sps:$4 sm:$0xff]   ;;  %v5361_v36 = vld [vmem:[#allocation5 + $0x84c] ss:$16 sps:$4 sm:$0xff]  }
 0x12b   :  { %3365 = vmatprep.subr.bf16.mxu0 %v5274_v37  ;;  %3709 = vmatprep.subr.bf16.mxu1 %v5277_v38  ;;  %v5356_v37 = vld [vmem:[#allocation5 + $0x840] ss:$16 sps:$4 sm:$0xff]   ;;  %v5359_v38 = vld [vmem:[#allocation5 + $0x848] ss:$16 sps:$4 sm:$0xff]  }
 0x12e   :  { %3366 = vmatpush1.bf16.msra.mxu0 %v5272_v39  ;;  %3710 = vmatpush1.bf16.msra.mxu1 %v5275_v40  ;;  %v5364_v39 = vld [vmem:[#allocation5 + $0x864] ss:$16 sps:$4 sm:$0xff]   ;;  %v5367_v40 = vld [vmem:[#allocation5 + $0x86c] ss:$16 sps:$4 sm:$0xff]  }
 0x12f   :  { %3367 = vmatprep.subr.bf16.mxu0 %v5280_v41  ;;  %3711 = vmatprep.subr.bf16.mxu1 %v5283_v42  ;;  %v5362_v41 = vld [vmem:[#allocation5 + $0x860] ss:$16 sps:$4 sm:$0xff]   ;;  %v5365_v42 = vld [vmem:[#allocation5 + $0x868] ss:$16 sps:$4 sm:$0xff]  }
 0x132   :  { %3368 = vmatpush1.bf16.msra.mxu0 %v5278_v43  ;;  %3712 = vmatpush1.bf16.msra.mxu1 %v5281_v44  ;;  %v5370_v43 = vld [vmem:[#allocation5 + $0x884] ss:$16 sps:$4 sm:$0xff]   ;;  %v5373_v44 = vld [vmem:[#allocation5 + $0x88c] ss:$16 sps:$4 sm:$0xff]  }
 0x133   :  { %3369 = vmatprep.subr.bf16.mxu0 %v5286_v45  ;;  %3713 = vmatprep.subr.bf16.mxu1 %v5289_v46  ;;  %v5368_v45 = vld [vmem:[#allocation5 + $0x880] ss:$16 sps:$4 sm:$0xff]   ;;  %v5371_v46 = vld [vmem:[#allocation5 + $0x888] ss:$16 sps:$4 sm:$0xff]  }
 0x136   :  { %3370 = vmatpush1.bf16.msra.mxu0 %v5284_v47  ;;  %3714 = vmatpush1.bf16.msra.mxu1 %v5287_v48  ;;  %v5376_v47 = vld [vmem:[#allocation5 + $0x8a4] ss:$16 sps:$4 sm:$0xff]   ;;  %v5379_v48 = vld [vmem:[#allocation5 + $0x8ac] ss:$16 sps:$4 sm:$0xff]  }
 0x137   :  { %3371 = vmatprep.subr.bf16.mxu0 %v5292_v49  ;;  %3715 = vmatprep.subr.bf16.mxu1 %v5295_v50  ;;  %v5374_v49 = vld [vmem:[#allocation5 + $0x8a0] ss:$16 sps:$4 sm:$0xff]   ;;  %v5377_v50 = vld [vmem:[#allocation5 + $0x8a8] ss:$16 sps:$4 sm:$0xff]  }
 0x13a   :  { %3372 = vmatpush1.bf16.msra.mxu0 %v5290_v51  ;;  %3716 = vmatpush1.bf16.msra.mxu1 %v5293_v52  ;;  %v5382_v51 = vld [vmem:[#allocation5 + $0x8c4] ss:$16 sps:$4 sm:$0xff]   ;;  %v5385_v52 = vld [vmem:[#allocation5 + $0x8cc] ss:$16 sps:$4 sm:$0xff]  }
 0x13b   :  { %3373 = vmatprep.subr.bf16.mxu0 %v5298_v53  ;;  %3717 = vmatprep.subr.bf16.mxu1 %v5301_v54  ;;  %v5380_v53 = vld [vmem:[#allocation5 + $0x8c0] ss:$16 sps:$4 sm:$0xff]   ;;  %v5383_v54 = vld [vmem:[#allocation5 + $0x8c8] ss:$16 sps:$4 sm:$0xff]  }
 0x13e   :  { %3374 = vmatpush1.bf16.msra.mxu0 %v5296_v55  ;;  %3718 = vmatpush1.bf16.msra.mxu1 %v5299_v56  ;;  %v5388_v55 = vld [vmem:[#allocation5 + $0x8e4] ss:$16 sps:$4 sm:$0xff]   ;;  %v5391_v56 = vld [vmem:[#allocation5 + $0x8ec] ss:$16 sps:$4 sm:$0xff]  }
 0x13f   :  { %3375 = vmatprep.subr.bf16.mxu0 %v5304_v57  ;;  %3719 = vmatprep.subr.bf16.mxu1 %v5307_v58  ;;  %v5386_v57 = vld [vmem:[#allocation5 + $0x8e0] ss:$16 sps:$4 sm:$0xff]   ;;  %v5389_v58 = vld [vmem:[#allocation5 + $0x8e8] ss:$16 sps:$4 sm:$0xff]  }
 0x142   :  { %3376 = vmatpush1.bf16.msra.mxu0 %v5302_v59  ;;  %3720 = vmatpush1.bf16.msra.mxu1 %v5305_v60  ;;  %v5394_v59 = vld [vmem:[#allocation5 + $0x904] ss:$16 sps:$4 sm:$0xff]   ;;  %v5397_v60 = vld [vmem:[#allocation5 + $0x90c] ss:$16 sps:$4 sm:$0xff]  }
 0x143   :  { %3377 = vmatprep.subr.bf16.mxu0 %v5310_v61  ;;  %3721 = vmatprep.subr.bf16.mxu1 %v5313_v62  ;;  %v5392_v61 = vld [vmem:[#allocation5 + $0x900] ss:$16 sps:$4 sm:$0xff]   ;;  %v5395_v62 = vld [vmem:[#allocation5 + $0x908] ss:$16 sps:$4 sm:$0xff]  }
 0x146   :  { %3378 = vmatpush1.bf16.msra.mxu0 %v5308_v63  ;;  %3722 = vmatpush1.bf16.msra.mxu1 %v5311_v0  ;;  %v5400_v63 = vld [vmem:[#allocation5 + $0x924] ss:$16 sps:$4 sm:$0xff]   ;;  %v5403_v0 = vld [vmem:[#allocation5 + $0x92c] ss:$16 sps:$4 sm:$0xff]  }
 0x147   :  { %3379 = vmatprep.subr.bf16.mxu0 %v5316_v1  ;;  %3723 = vmatprep.subr.bf16.mxu1 %v5319_v2  ;;  %v5398_v1 = vld [vmem:[#allocation5 + $0x920] ss:$16 sps:$4 sm:$0xff]   ;;  %v5401_v2 = vld [vmem:[#allocation5 + $0x928] ss:$16 sps:$4 sm:$0xff]  }
 0x14a   :  { %3380 = vmatpush1.bf16.msra.mxu0 %v5314_v3  ;;  %3724 = vmatpush1.bf16.msra.mxu1 %v5317_v4  ;;  %v5406_v3 = vld [vmem:[#allocation5 + $0x944] ss:$16 sps:$4 sm:$0xff]   ;;  %v5409_v4 = vld [vmem:[#allocation5 + $0x94c] ss:$16 sps:$4 sm:$0xff]  }
 0x14b   :  { %3381 = vmatprep.subr.bf16.mxu0 %v5322_v5  ;;  %3725 = vmatprep.subr.bf16.mxu1 %v5325_v6  ;;  %v5404_v5 = vld [vmem:[#allocation5 + $0x940] ss:$16 sps:$4 sm:$0xff]   ;;  %v5407_v6 = vld [vmem:[#allocation5 + $0x948] ss:$16 sps:$4 sm:$0xff]  }
 0x14e   :  { %3382 = vmatpush1.bf16.msra.mxu0 %v5320_v7  ;;  %3726 = vmatpush1.bf16.msra.mxu1 %v5323_v8  ;;  %v5412_v7 = vld [vmem:[#allocation5 + $0x964] ss:$16 sps:$4 sm:$0xff]   ;;  %v5415_v8 = vld [vmem:[#allocation5 + $0x96c] ss:$16 sps:$4 sm:$0xff]  }
 0x14f   :  { %3383 = vmatprep.subr.bf16.mxu0 %v5328_v9  ;;  %3727 = vmatprep.subr.bf16.mxu1 %v5331_v10  ;;  %v5410_v9 = vld [vmem:[#allocation5 + $0x960] ss:$16 sps:$4 sm:$0xff]   ;;  %v5413_v10 = vld [vmem:[#allocation5 + $0x968] ss:$16 sps:$4 sm:$0xff]  }
 0x152   :  { %3384 = vmatpush1.bf16.msra.mxu0 %v5326_v11  ;;  %3728 = vmatpush1.bf16.msra.mxu1 %v5329_v12  ;;  %v5418_v11 = vld [vmem:[#allocation5 + $0x984] ss:$16 sps:$4 sm:$0xff]   ;;  %v5421_v12 = vld [vmem:[#allocation5 + $0x98c] ss:$16 sps:$4 sm:$0xff]  }
 0x153   :  { %3385 = vmatprep.subr.bf16.mxu0 %v5334_v13  ;;  %3729 = vmatprep.subr.bf16.mxu1 %v5337_v14  ;;  %v5416_v13 = vld [vmem:[#allocation5 + $0x980] ss:$16 sps:$4 sm:$0xff]   ;;  %v5419_v14 = vld [vmem:[#allocation5 + $0x988] ss:$16 sps:$4 sm:$0xff]  }
 0x156   :  { %3386 = vmatpush1.bf16.msra.mxu0 %v5332_v15  ;;  %3730 = vmatpush1.bf16.msra.mxu1 %v5335_v16  ;;  %v5424_v15 = vld [vmem:[#allocation5 + $0x9a4] ss:$16 sps:$4 sm:$0xff]   ;;  %v5427_v16 = vld [vmem:[#allocation5 + $0x9ac] ss:$16 sps:$4 sm:$0xff]  }
 0x157   :  { %3387 = vmatprep.subr.bf16.mxu0 %v5340_v17  ;;  %3731 = vmatprep.subr.bf16.mxu1 %v5343_v18  ;;  %v5422_v17 = vld [vmem:[#allocation5 + $0x9a0] ss:$16 sps:$4 sm:$0xff]   ;;  %v5425_v18 = vld [vmem:[#allocation5 + $0x9a8] ss:$16 sps:$4 sm:$0xff]  }
 0x15a   :  { %3388 = vmatpush1.bf16.msra.mxu0 %v5338_v19  ;;  %3732 = vmatpush1.bf16.msra.mxu1 %v5341_v20  ;;  %v5430_v19 = vld [vmem:[#allocation5 + $0x9c4] ss:$16 sps:$4 sm:$0xff]   ;;  %v5433_v20 = vld [vmem:[#allocation5 + $0x9cc] ss:$16 sps:$4 sm:$0xff]  }
 0x15b   :  { %3400 = vmatprep.subr.bf16.mxu0 %v5346_v21  ;;  %3744 = vmatprep.subr.bf16.mxu1 %v5349_v24  ;;  %v5428_v21 = vld [vmem:[#allocation5 + $0x9c0] ss:$16 sps:$4 sm:$0xff]   ;;  %v5439_v24 = vld [vmem:[#allocation5 + $0x9ec] ss:$16 sps:$4 sm:$0xff]  }
 0x15d   :  { %3390 = vmatmul.mubr.bf16.vlgmr.msra.gmra.mrb[0].mxu0 %v124_v27  ;;  %3734 = vmatmul.mubr.bf16.vlgmr.msra.gmra.mrb[0].mxu1 %v124_v27  ;;  %v5442_v27 = vld [vmem:[#allocation5 + $0xa04] ss:$16 sps:$4 sm:$0xff]  }
 0x15e   :  { %3401 = vmatpush1.bf16.msra.mxu0 %v5344_v25  ;;  %3745 = vmatpush1.bf16.msra.mxu1 %v5347_v26  ;;  %v5434_v25 = vld [vmem:[#allocation5 + $0x9e0] ss:$16 sps:$4 sm:$0xff]   ;;  %v5437_v26 = vld [vmem:[#allocation5 + $0x9e8] ss:$16 sps:$4 sm:$0xff]  }
 0x15f   :  { %3402 = vmatprep.subr.bf16.mxu0 %v5352_v30  ;;  %3746 = vmatprep.subr.bf16.mxu1 %v5355_v31  ;;  %v110_v30 = vld [vmem:[#allocation2 + $0xc0] sm:$0xff]  ;;  %v97_v31 = vld [vmem:[#allocation2 + $0x58] sm:$0xff] }
 0x160   :  { %3432 = vmatprep.mubr.bf16.mxu0 %v127_v32  ;;  %3776 = vmatprep.mubr.bf16.mxu1 %v127_v32  ;;  %v113_v32 = vld [vmem:[#allocation2 + $0xd8] sm:$0xff] }
 0x162   :  { %3403 = vmatpush1.bf16.msra.mxu0 %v5350_v33  ;;  %3747 = vmatpush1.bf16.msra.mxu1 %v5353_v34  ;;  %v126_v33 = vpack.c.bf16 %v110_v30, %v94_v29  ;;  %v5440_v34 = vld [vmem:[#allocation5 + $0xa00] ss:$16 sps:$4 sm:$0xff]   ;;  %v5532_v29 = vld [vmem:[#allocation5 + $0xbe4] ss:$16 sps:$4 sm:$0xff]   ;;  %v5535_v30 = vld [vmem:[#allocation5 + $0xbec] ss:$16 sps:$4 sm:$0xff]  }
 0x163   :  { %3404 = vmatprep.subr.bf16.mxu0 %v5358_v35  ;;  %3748 = vmatprep.subr.bf16.mxu1 %v5361_v36  ;;  %v5443_v35 = vld [vmem:[#allocation5 + $0xa08] ss:$16 sps:$4 sm:$0xff]   ;;  %v5448_v36 = vld [vmem:[#allocation5 + $0xa24] ss:$16 sps:$4 sm:$0xff]  }
 0x166   :  { %3405 = vmatpush1.bf16.msra.mxu0 %v5356_v37  ;;  %3749 = vmatpush1.bf16.msra.mxu1 %v5359_v38  ;;  %v5451_v37 = vld [vmem:[#allocation5 + $0xa2c] ss:$16 sps:$4 sm:$0xff]   ;;  %v129_v38 = vpack.c.bf16 %v113_v32, %v97_v31  ;;  %v5530_v31 = vld [vmem:[#allocation5 + $0xbe0] ss:$16 sps:$4 sm:$0xff]   ;;  %v5533_v32 = vld [vmem:[#allocation5 + $0xbe8] ss:$16 sps:$4 sm:$0xff]  }
 0x167   :  { %3406 = vmatprep.subr.bf16.mxu0 %v5364_v39  ;;  %3750 = vmatprep.subr.bf16.mxu1 %v5367_v40  ;;  %v5446_v39 = vld [vmem:[#allocation5 + $0xa20] ss:$16 sps:$4 sm:$0xff]   ;;  %v5449_v40 = vld [vmem:[#allocation5 + $0xa28] ss:$16 sps:$4 sm:$0xff]  }
 0x16a   :  { %3407 = vmatpush1.bf16.msra.mxu0 %v5362_v41  ;;  %3751 = vmatpush1.bf16.msra.mxu1 %v5365_v42  ;;  %v5454_v41 = vld [vmem:[#allocation5 + $0xa44] ss:$16 sps:$4 sm:$0xff]   ;;  %v5457_v42 = vld [vmem:[#allocation5 + $0xa4c] ss:$16 sps:$4 sm:$0xff]  }
 0x16b   :  { %3408 = vmatprep.subr.bf16.mxu0 %v5370_v43  ;;  %3752 = vmatprep.subr.bf16.mxu1 %v5373_v44  ;;  %v5452_v43 = vld [vmem:[#allocation5 + $0xa40] ss:$16 sps:$4 sm:$0xff]   ;;  %v5455_v44 = vld [vmem:[#allocation5 + $0xa48] ss:$16 sps:$4 sm:$0xff]  }
 0x16e   :  { %3409 = vmatpush1.bf16.msra.mxu0 %v5368_v45  ;;  %3753 = vmatpush1.bf16.msra.mxu1 %v5371_v46  ;;  %v5460_v45 = vld [vmem:[#allocation5 + $0xa64] ss:$16 sps:$4 sm:$0xff]   ;;  %v5463_v46 = vld [vmem:[#allocation5 + $0xa6c] ss:$16 sps:$4 sm:$0xff]  }
 0x16f   :  { %3410 = vmatprep.subr.bf16.mxu0 %v5376_v47  ;;  %3754 = vmatprep.subr.bf16.mxu1 %v5379_v48  ;;  %v5458_v47 = vld [vmem:[#allocation5 + $0xa60] ss:$16 sps:$4 sm:$0xff]   ;;  %v5461_v48 = vld [vmem:[#allocation5 + $0xa68] ss:$16 sps:$4 sm:$0xff]  }
 0x172   :  { %3411 = vmatpush1.bf16.msra.mxu0 %v5374_v49  ;;  %3755 = vmatpush1.bf16.msra.mxu1 %v5377_v50  ;;  %v5466_v49 = vld [vmem:[#allocation5 + $0xa84] ss:$16 sps:$4 sm:$0xff]   ;;  %v5469_v50 = vld [vmem:[#allocation5 + $0xa8c] ss:$16 sps:$4 sm:$0xff]  }
 0x173   :  { %3412 = vmatprep.subr.bf16.mxu0 %v5382_v51  ;;  %3756 = vmatprep.subr.bf16.mxu1 %v5385_v52  ;;  %v5464_v51 = vld [vmem:[#allocation5 + $0xa80] ss:$16 sps:$4 sm:$0xff]   ;;  %v5467_v52 = vld [vmem:[#allocation5 + $0xa88] ss:$16 sps:$4 sm:$0xff]  }
 0x176   :  { %3413 = vmatpush1.bf16.msra.mxu0 %v5380_v53  ;;  %3757 = vmatpush1.bf16.msra.mxu1 %v5383_v54  ;;  %v5472_v53 = vld [vmem:[#allocation5 + $0xaa4] ss:$16 sps:$4 sm:$0xff]   ;;  %v5475_v54 = vld [vmem:[#allocation5 + $0xaac] ss:$16 sps:$4 sm:$0xff]  }
 0x177   :  { %3414 = vmatprep.subr.bf16.mxu0 %v5388_v55  ;;  %3758 = vmatprep.subr.bf16.mxu1 %v5391_v56  ;;  %v5470_v55 = vld [vmem:[#allocation5 + $0xaa0] ss:$16 sps:$4 sm:$0xff]   ;;  %v5473_v56 = vld [vmem:[#allocation5 + $0xaa8] ss:$16 sps:$4 sm:$0xff]  }
 0x17a   :  { %3415 = vmatpush1.bf16.msra.mxu0 %v5386_v57  ;;  %3759 = vmatpush1.bf16.msra.mxu1 %v5389_v58  ;;  %v5478_v57 = vld [vmem:[#allocation5 + $0xac4] ss:$16 sps:$4 sm:$0xff]   ;;  %v5481_v58 = vld [vmem:[#allocation5 + $0xacc] ss:$16 sps:$4 sm:$0xff]  }
 0x17b   :  { %3416 = vmatprep.subr.bf16.mxu0 %v5394_v59  ;;  %3760 = vmatprep.subr.bf16.mxu1 %v5397_v60  ;;  %v5476_v59 = vld [vmem:[#allocation5 + $0xac0] ss:$16 sps:$4 sm:$0xff]   ;;  %v5479_v60 = vld [vmem:[#allocation5 + $0xac8] ss:$16 sps:$4 sm:$0xff]  }
 0x17e   :  { %3417 = vmatpush1.bf16.msra.mxu0 %v5392_v61  ;;  %3761 = vmatpush1.bf16.msra.mxu1 %v5395_v62  ;;  %v5484_v61 = vld [vmem:[#allocation5 + $0xae4] ss:$16 sps:$4 sm:$0xff]   ;;  %v5487_v62 = vld [vmem:[#allocation5 + $0xaec] ss:$16 sps:$4 sm:$0xff]  }
 0x17f   :  { %3418 = vmatprep.subr.bf16.mxu0 %v5400_v63  ;;  %3762 = vmatprep.subr.bf16.mxu1 %v5403_v0  ;;  %v5482_v63 = vld [vmem:[#allocation5 + $0xae0] ss:$16 sps:$4 sm:$0xff]   ;;  %v5485_v0 = vld [vmem:[#allocation5 + $0xae8] ss:$16 sps:$4 sm:$0xff]  }
 0x182   :  { %3419 = vmatpush1.bf16.msra.mxu0 %v5398_v1  ;;  %3763 = vmatpush1.bf16.msra.mxu1 %v5401_v2  ;;  %v5490_v1 = vld [vmem:[#allocation5 + $0xb04] ss:$16 sps:$4 sm:$0xff]   ;;  %v5493_v2 = vld [vmem:[#allocation5 + $0xb0c] ss:$16 sps:$4 sm:$0xff]  }
 0x183   :  { %3420 = vmatprep.subr.bf16.mxu0 %v5406_v3  ;;  %3764 = vmatprep.subr.bf16.mxu1 %v5409_v4  ;;  %v5488_v3 = vld [vmem:[#allocation5 + $0xb00] ss:$16 sps:$4 sm:$0xff]   ;;  %v5491_v4 = vld [vmem:[#allocation5 + $0xb08] ss:$16 sps:$4 sm:$0xff]  }
 0x186   :  { %3421 = vmatpush1.bf16.msra.mxu0 %v5404_v5  ;;  %3765 = vmatpush1.bf16.msra.mxu1 %v5407_v6  ;;  %v5496_v5 = vld [vmem:[#allocation5 + $0xb24] ss:$16 sps:$4 sm:$0xff]   ;;  %v5499_v6 = vld [vmem:[#allocation5 + $0xb2c] ss:$16 sps:$4 sm:$0xff]  }
 0x187   :  { %3422 = vmatprep.subr.bf16.mxu0 %v5412_v7  ;;  %3766 = vmatprep.subr.bf16.mxu1 %v5415_v8  ;;  %v5494_v7 = vld [vmem:[#allocation5 + $0xb20] ss:$16 sps:$4 sm:$0xff]   ;;  %v5497_v8 = vld [vmem:[#allocation5 + $0xb28] ss:$16 sps:$4 sm:$0xff]  }
 0x18a   :  { %3423 = vmatpush1.bf16.msra.mxu0 %v5410_v9  ;;  %3767 = vmatpush1.bf16.msra.mxu1 %v5413_v10  ;;  %v5502_v9 = vld [vmem:[#allocation5 + $0xb44] ss:$16 sps:$4 sm:$0xff]   ;;  %v5505_v10 = vld [vmem:[#allocation5 + $0xb4c] ss:$16 sps:$4 sm:$0xff]  }
 0x18b   :  { %3424 = vmatprep.subr.bf16.mxu0 %v5418_v11  ;;  %3768 = vmatprep.subr.bf16.mxu1 %v5421_v12  ;;  %v5500_v11 = vld [vmem:[#allocation5 + $0xb40] ss:$16 sps:$4 sm:$0xff]   ;;  %v5503_v12 = vld [vmem:[#allocation5 + $0xb48] ss:$16 sps:$4 sm:$0xff]  }
 0x18e   :  { %3425 = vmatpush1.bf16.msra.mxu0 %v5416_v13  ;;  %3769 = vmatpush1.bf16.msra.mxu1 %v5419_v14  ;;  %v5508_v13 = vld [vmem:[#allocation5 + $0xb64] ss:$16 sps:$4 sm:$0xff]   ;;  %v5511_v14 = vld [vmem:[#allocation5 + $0xb6c] ss:$16 sps:$4 sm:$0xff]  }
 0x18f   :  { %3426 = vmatprep.subr.bf16.mxu0 %v5424_v15  ;;  %3770 = vmatprep.subr.bf16.mxu1 %v5427_v16  ;;  %v5506_v15 = vld [vmem:[#allocation5 + $0xb60] ss:$16 sps:$4 sm:$0xff]   ;;  %v5509_v16 = vld [vmem:[#allocation5 + $0xb68] ss:$16 sps:$4 sm:$0xff]  }
 0x192   :  { %3427 = vmatpush1.bf16.msra.mxu0 %v5422_v17  ;;  %3771 = vmatpush1.bf16.msra.mxu1 %v5425_v18  ;;  %v5514_v17 = vld [vmem:[#allocation5 + $0xb84] ss:$16 sps:$4 sm:$0xff]   ;;  %v5517_v18 = vld [vmem:[#allocation5 + $0xb8c] ss:$16 sps:$4 sm:$0xff]  }
 0x193   :  { %3428 = vmatprep.subr.bf16.mxu0 %v5430_v19  ;;  %3772 = vmatprep.subr.bf16.mxu1 %v5433_v20  ;;  %v5512_v19 = vld [vmem:[#allocation5 + $0xb80] ss:$16 sps:$4 sm:$0xff]   ;;  %v5515_v20 = vld [vmem:[#allocation5 + $0xb88] ss:$16 sps:$4 sm:$0xff]  }
 0x196   :  { %3429 = vmatpush1.bf16.msra.mxu0 %v5428_v21  ;;  %3773 = vmatpush1.bf16.msra.mxu1 %v5431_v22  ;;  %v5520_v21 = vld [vmem:[#allocation5 + $0xba4] ss:$16 sps:$4 sm:$0xff]   ;;  %v5523_v22 = vld [vmem:[#allocation5 + $0xbac] ss:$16 sps:$4 sm:$0xff]  }
 0x197   :  { %3430 = vmatprep.subr.bf16.mxu0 %v5436_v23  ;;  %3774 = vmatprep.subr.bf16.mxu1 %v5439_v24  ;;  %v5518_v23 = vld [vmem:[#allocation5 + $0xba0] ss:$16 sps:$4 sm:$0xff]   ;;  %v5521_v24 = vld [vmem:[#allocation5 + $0xba8] ss:$16 sps:$4 sm:$0xff]  }
 0x19a   :  { %3431 = vmatpush1.bf16.msra.mxu0 %v5434_v25  ;;  %3775 = vmatpush1.bf16.msra.mxu1 %v5437_v26  ;;  %v5526_v25 = vld [vmem:[#allocation5 + $0xbc4] ss:$16 sps:$4 sm:$0xff]   ;;  %v5529_v26 = vld [vmem:[#allocation5 + $0xbcc] ss:$16 sps:$4 sm:$0xff]  }
 0x19b   :  { %3443 = vmatprep.subr.bf16.mxu0 %v5442_v27  ;;  %3787 = vmatprep.subr.bf16.mxu1 %v5445_v28  ;;  %v5524_v27 = vld [vmem:[#allocation5 + $0xbc0] ss:$16 sps:$4 sm:$0xff]   ;;  %v5527_v28 = vld [vmem:[#allocation5 + $0xbc8] ss:$16 sps:$4 sm:$0xff]  }
 0x19d   :  { %3433 = vmatmul.mubr.bf16.vlgmr.msra.gmra.mrb[0].mxu0 %v126_v33  ;;  %3777 = vmatmul.mubr.bf16.vlgmr.msra.gmra.mrb[0].mxu1 %v126_v33  ;;  %v96_v33 = vld [vmem:[#allocation2 + $0x50] sm:$0xff] }
 0x19e   :  { %3444 = vmatpush1.bf16.msra.mxu0 %v5440_v34  ;;  %3788 = vmatpush1.bf16.msra.mxu1 %v5443_v35  ;;  %v112_v34 = vld [vmem:[#allocation2 + $0xd0] sm:$0xff] }
 0x19f   :  { %3445 = vmatprep.subr.bf16.mxu0 %v5448_v36  ;;  %3789 = vmatprep.subr.bf16.mxu1 %v5451_v37  ;;  %v5538_v35 = vld [vmem:[#allocation5 + $0xc04] ss:$16 sps:$4 sm:$0xff]   ;;  %v5541_v36 = vld [vmem:[#allocation5 + $0xc0c] ss:$16 sps:$4 sm:$0xff]   ;;  %v128_v37 = vpack.c.bf16 %v112_v34, %v96_v33  ;;  %v5620_v33 = vld [vmem:[#allocation5 + $0xdc0] ss:$16 sps:$4 sm:$0xff]  }
 0x1a0   :  { %3475 = vmatprep.mubr.bf16.mxu0 %v129_v38  ;;  %3819 = vmatprep.mubr.bf16.mxu1 %v129_v38  ;;  %v99_v38 = vld [vmem:[#allocation2 + $0x68] sm:$0xff] }
 0x1a1   :  { %v5623_v34 = vld [vmem:[#allocation5 + $0xdc8] ss:$16 sps:$4 sm:$0xff]  }
 0x1a2   :  { %3446 = vmatpush1.bf16.msra.mxu0 %v5446_v39  ;;  %3790 = vmatpush1.bf16.msra.mxu1 %v5449_v40  ;;  %v115_v39 = vld [vmem:[#allocation2 + $0xe8] sm:$0xff]  ;;  %v5536_v40 = vld [vmem:[#allocation5 + $0xc00] ss:$16 sps:$4 sm:$0xff]  }
 0x1a3   :  { %3447 = vmatprep.subr.bf16.mxu0 %v5454_v41  ;;  %3791 = vmatprep.subr.bf16.mxu1 %v5457_v42  ;;  %v5539_v41 = vld [vmem:[#allocation5 + $0xc08] ss:$16 sps:$4 sm:$0xff]   ;;  %v5544_v42 = vld [vmem:[#allocation5 + $0xc24] ss:$16 sps:$4 sm:$0xff]  }
 0x1a6   :  { %3448 = vmatpush1.bf16.msra.mxu0 %v5452_v43  ;;  %3792 = vmatpush1.bf16.msra.mxu1 %v5455_v44  ;;  %v5547_v43 = vld [vmem:[#allocation5 + $0xc2c] ss:$16 sps:$4 sm:$0xff]   ;;  %v131_v44 = vpack.c.bf16 %v115_v39, %v99_v38  ;;  %v5629_v38 = vld [vmem:[#allocation5 + $0xde8] ss:$16 sps:$4 sm:$0xff]   ;;  %v98_v39 = vld [vmem:[#allocation2 + $0x60] sm:$0xff] }
 0x1a7   :  { %3449 = vmatprep.subr.bf16.mxu0 %v5460_v45  ;;  %3793 = vmatprep.subr.bf16.mxu1 %v5463_v46  ;;  %v5542_v45 = vld [vmem:[#allocation5 + $0xc20] ss:$16 sps:$4 sm:$0xff]   ;;  %v5545_v46 = vld [vmem:[#allocation5 + $0xc28] ss:$16 sps:$4 sm:$0xff]  }
 0x1aa   :  { %3450 = vmatpush1.bf16.msra.mxu0 %v5458_v47  ;;  %3794 = vmatpush1.bf16.msra.mxu1 %v5461_v48  ;;  %v5550_v47 = vld [vmem:[#allocation5 + $0xc44] ss:$16 sps:$4 sm:$0xff]   ;;  %v5553_v48 = vld [vmem:[#allocation5 + $0xc4c] ss:$16 sps:$4 sm:$0xff]  }
 0x1ab   :  { %3451 = vmatprep.subr.bf16.mxu0 %v5466_v49  ;;  %3795 = vmatprep.subr.bf16.mxu1 %v5469_v50  ;;  %v5548_v49 = vld [vmem:[#allocation5 + $0xc40] ss:$16 sps:$4 sm:$0xff]   ;;  %v5551_v50 = vld [vmem:[#allocation5 + $0xc48] ss:$16 sps:$4 sm:$0xff]  }
 0x1ae   :  { %3452 = vmatpush1.bf16.msra.mxu0 %v5464_v51  ;;  %3796 = vmatpush1.bf16.msra.mxu1 %v5467_v52  ;;  %v5556_v51 = vld [vmem:[#allocation5 + $0xc64] ss:$16 sps:$4 sm:$0xff]   ;;  %v5559_v52 = vld [vmem:[#allocation5 + $0xc6c] ss:$16 sps:$4 sm:$0xff]  }
 0x1af   :  { %3453 = vmatprep.subr.bf16.mxu0 %v5472_v53  ;;  %3797 = vmatprep.subr.bf16.mxu1 %v5475_v54  ;;  %v5554_v53 = vld [vmem:[#allocation5 + $0xc60] ss:$16 sps:$4 sm:$0xff]   ;;  %v5557_v54 = vld [vmem:[#allocation5 + $0xc68] ss:$16 sps:$4 sm:$0xff]  }
 0x1b2   :  { %3454 = vmatpush1.bf16.msra.mxu0 %v5470_v55  ;;  %3798 = vmatpush1.bf16.msra.mxu1 %v5473_v56  ;;  %v5562_v55 = vld [vmem:[#allocation5 + $0xc84] ss:$16 sps:$4 sm:$0xff]   ;;  %v5565_v56 = vld [vmem:[#allocation5 + $0xc8c] ss:$16 sps:$4 sm:$0xff]  }
 0x1b3   :  { %3455 = vmatprep.subr.bf16.mxu0 %v5478_v57  ;;  %3799 = vmatprep.subr.bf16.mxu1 %v5481_v58  ;;  %v5560_v57 = vld [vmem:[#allocation5 + $0xc80] ss:$16 sps:$4 sm:$0xff]   ;;  %v5563_v58 = vld [vmem:[#allocation5 + $0xc88] ss:$16 sps:$4 sm:$0xff]  }
 0x1b6   :  { %3456 = vmatpush1.bf16.msra.mxu0 %v5476_v59  ;;  %3800 = vmatpush1.bf16.msra.mxu1 %v5479_v60  ;;  %v5568_v59 = vld [vmem:[#allocation5 + $0xca4] ss:$16 sps:$4 sm:$0xff]   ;;  %v5571_v60 = vld [vmem:[#allocation5 + $0xcac] ss:$16 sps:$4 sm:$0xff]  }
 0x1b7   :  { %3457 = vmatprep.subr.bf16.mxu0 %v5484_v61  ;;  %3801 = vmatprep.subr.bf16.mxu1 %v5487_v62  ;;  %v5566_v61 = vld [vmem:[#allocation5 + $0xca0] ss:$16 sps:$4 sm:$0xff]   ;;  %v5569_v62 = vld [vmem:[#allocation5 + $0xca8] ss:$16 sps:$4 sm:$0xff]  }
 0x1ba   :  { %3458 = vmatpush1.bf16.msra.mxu0 %v5482_v63  ;;  %3802 = vmatpush1.bf16.msra.mxu1 %v5485_v0  ;;  %v5574_v63 = vld [vmem:[#allocation5 + $0xcc4] ss:$16 sps:$4 sm:$0xff]   ;;  %v5577_v0 = vld [vmem:[#allocation5 + $0xccc] ss:$16 sps:$4 sm:$0xff]  }
 0x1bb   :  { %3459 = vmatprep.subr.bf16.mxu0 %v5490_v1  ;;  %3803 = vmatprep.subr.bf16.mxu1 %v5493_v2  ;;  %v5572_v1 = vld [vmem:[#allocation5 + $0xcc0] ss:$16 sps:$4 sm:$0xff]   ;;  %v5575_v2 = vld [vmem:[#allocation5 + $0xcc8] ss:$16 sps:$4 sm:$0xff]  }
 0x1be   :  { %3460 = vmatpush1.bf16.msra.mxu0 %v5488_v3  ;;  %3804 = vmatpush1.bf16.msra.mxu1 %v5491_v4  ;;  %v5580_v3 = vld [vmem:[#allocation5 + $0xce4] ss:$16 sps:$4 sm:$0xff]   ;;  %v5583_v4 = vld [vmem:[#allocation5 + $0xcec] ss:$16 sps:$4 sm:$0xff]  }
 0x1bf   :  { %3461 = vmatprep.subr.bf16.mxu0 %v5496_v5  ;;  %3805 = vmatprep.subr.bf16.mxu1 %v5499_v6  ;;  %v5578_v5 = vld [vmem:[#allocation5 + $0xce0] ss:$16 sps:$4 sm:$0xff]   ;;  %v5581_v6 = vld [vmem:[#allocation5 + $0xce8] ss:$16 sps:$4 sm:$0xff]  }
 0x1c2   :  { %3462 = vmatpush1.bf16.msra.mxu0 %v5494_v7  ;;  %3806 = vmatpush1.bf16.msra.mxu1 %v5497_v8  ;;  %v5586_v7 = vld [vmem:[#allocation5 + $0xd04] ss:$16 sps:$4 sm:$0xff]   ;;  %v5589_v8 = vld [vmem:[#allocation5 + $0xd0c] ss:$16 sps:$4 sm:$0xff]  }
 0x1c3   :  { %3463 = vmatprep.subr.bf16.mxu0 %v5502_v9  ;;  %3807 = vmatprep.subr.bf16.mxu1 %v5505_v10  ;;  %v5584_v9 = vld [vmem:[#allocation5 + $0xd00] ss:$16 sps:$4 sm:$0xff]   ;;  %v5587_v10 = vld [vmem:[#allocation5 + $0xd08] ss:$16 sps:$4 sm:$0xff]  }
 0x1c6   :  { %3464 = vmatpush1.bf16.msra.mxu0 %v5500_v11  ;;  %3808 = vmatpush1.bf16.msra.mxu1 %v5503_v12  ;;  %v5592_v11 = vld [vmem:[#allocation5 + $0xd24] ss:$16 sps:$4 sm:$0xff]   ;;  %v5595_v12 = vld [vmem:[#allocation5 + $0xd2c] ss:$16 sps:$4 sm:$0xff]  }
 0x1c7   :  { %3465 = vmatprep.subr.bf16.mxu0 %v5508_v13  ;;  %3809 = vmatprep.subr.bf16.mxu1 %v5511_v14  ;;  %v5590_v13 = vld [vmem:[#allocation5 + $0xd20] ss:$16 sps:$4 sm:$0xff]   ;;  %v5593_v14 = vld [vmem:[#allocation5 + $0xd28] ss:$16 sps:$4 sm:$0xff]  }
 0x1ca   :  { %3466 = vmatpush1.bf16.msra.mxu0 %v5506_v15  ;;  %3810 = vmatpush1.bf16.msra.mxu1 %v5509_v16  ;;  %v5598_v15 = vld [vmem:[#allocation5 + $0xd44] ss:$16 sps:$4 sm:$0xff]   ;;  %v5601_v16 = vld [vmem:[#allocation5 + $0xd4c] ss:$16 sps:$4 sm:$0xff]  }
 0x1cb   :  { %3467 = vmatprep.subr.bf16.mxu0 %v5514_v17  ;;  %3811 = vmatprep.subr.bf16.mxu1 %v5517_v18  ;;  %v5596_v17 = vld [vmem:[#allocation5 + $0xd40] ss:$16 sps:$4 sm:$0xff]   ;;  %v5599_v18 = vld [vmem:[#allocation5 + $0xd48] ss:$16 sps:$4 sm:$0xff]  }
 0x1ce   :  { %3468 = vmatpush1.bf16.msra.mxu0 %v5512_v19  ;;  %3812 = vmatpush1.bf16.msra.mxu1 %v5515_v20  ;;  %v5604_v19 = vld [vmem:[#allocation5 + $0xd64] ss:$16 sps:$4 sm:$0xff]   ;;  %v5607_v20 = vld [vmem:[#allocation5 + $0xd6c] ss:$16 sps:$4 sm:$0xff]  }
 0x1cf   :  { %3469 = vmatprep.subr.bf16.mxu0 %v5520_v21  ;;  %3813 = vmatprep.subr.bf16.mxu1 %v5523_v22  ;;  %v5602_v21 = vld [vmem:[#allocation5 + $0xd60] ss:$16 sps:$4 sm:$0xff]   ;;  %v5605_v22 = vld [vmem:[#allocation5 + $0xd68] ss:$16 sps:$4 sm:$0xff]  }
 0x1d2   :  { %3470 = vmatpush1.bf16.msra.mxu0 %v5518_v23  ;;  %3814 = vmatpush1.bf16.msra.mxu1 %v5521_v24  ;;  %v5610_v23 = vld [vmem:[#allocation5 + $0xd84] ss:$16 sps:$4 sm:$0xff]   ;;  %v5613_v24 = vld [vmem:[#allocation5 + $0xd8c] ss:$16 sps:$4 sm:$0xff]  }
 0x1d3   :  { %3471 = vmatprep.subr.bf16.mxu0 %v5526_v25  ;;  %3815 = vmatprep.subr.bf16.mxu1 %v5529_v26  ;;  %v5608_v25 = vld [vmem:[#allocation5 + $0xd80] ss:$16 sps:$4 sm:$0xff]   ;;  %v5611_v26 = vld [vmem:[#allocation5 + $0xd88] ss:$16 sps:$4 sm:$0xff]  }
 0x1d6   :  { %3472 = vmatpush1.bf16.msra.mxu0 %v5524_v27  ;;  %3816 = vmatpush1.bf16.msra.mxu1 %v5527_v28  ;;  %v5616_v27 = vld [vmem:[#allocation5 + $0xda4] ss:$16 sps:$4 sm:$0xff]   ;;  %v5619_v28 = vld [vmem:[#allocation5 + $0xdac] ss:$16 sps:$4 sm:$0xff]  }
 0x1d7   :  { %3473 = vmatprep.subr.bf16.mxu0 %v5532_v29  ;;  %3817 = vmatprep.subr.bf16.mxu1 %v5535_v30  ;;  %v5614_v29 = vld [vmem:[#allocation5 + $0xda0] ss:$16 sps:$4 sm:$0xff]   ;;  %v5617_v30 = vld [vmem:[#allocation5 + $0xda8] ss:$16 sps:$4 sm:$0xff]  }
 0x1da   :  { %3474 = vmatpush1.bf16.msra.mxu0 %v5530_v31  ;;  %3818 = vmatpush1.bf16.msra.mxu1 %v5533_v32  ;;  %v5622_v31 = vld [vmem:[#allocation5 + $0xdc4] ss:$16 sps:$4 sm:$0xff]   ;;  %v5625_v32 = vld [vmem:[#allocation5 + $0xdcc] ss:$16 sps:$4 sm:$0xff]  }
 0x1db   :  { %3486 = vmatprep.subr.bf16.mxu0 %v5538_v35  ;;  %3830 = vmatprep.subr.bf16.mxu1 %v5541_v36  ;;  %v5628_v35 = vld [vmem:[#allocation5 + $0xde4] ss:$16 sps:$4 sm:$0xff]   ;;  %v5631_v36 = vld [vmem:[#allocation5 + $0xdec] ss:$16 sps:$4 sm:$0xff]  }
 0x1dd   :  { %3476 = vmatmul.mubr.bf16.vlgmr.msra.gmra.mrb[0].mxu0 %v128_v37  ;;  %3820 = vmatmul.mubr.bf16.vlgmr.msra.gmra.mrb[0].mxu1 %v128_v37  ;;  %v5626_v37 = vld [vmem:[#allocation5 + $0xde0] ss:$16 sps:$4 sm:$0xff]  }
 0x1de   :  { %3487 = vmatpush1.bf16.msra.mxu0 %v5536_v40  ;;  %3831 = vmatpush1.bf16.msra.mxu1 %v5539_v41  ;;  %v114_v40 = vld [vmem:[#allocation2 + $0xe0] sm:$0xff] }
 0x1df   :  { %3488 = vmatprep.subr.bf16.mxu0 %v5544_v42  ;;  %3832 = vmatprep.subr.bf16.mxu1 %v5547_v43  ;;  %v5634_v41 = vld [vmem:[#allocation5 + $0xe04] ss:$16 sps:$4 sm:$0xff]   ;;  %v5637_v42 = vld [vmem:[#allocation5 + $0xe0c] ss:$16 sps:$4 sm:$0xff]   ;;  %v130_v43 = vpack.c.bf16 %v114_v40, %v98_v39  ;;  %v5716_v39 = vld [vmem:[#allocation5 + $0xfc0] ss:$16 sps:$4 sm:$0xff]  }
 0x1e0   :  { %3518 = vmatprep.mubr.bf16.mxu0 %v131_v44  ;;  %3862 = vmatprep.mubr.bf16.mxu1 %v131_v44  ;;  %v101_v44 = vld [vmem:[#allocation2 + $0x78] sm:$0xff] }
 0x1e1   :  { %v5719_v40 = vld [vmem:[#allocation5 + $0xfc8] ss:$16 sps:$4 sm:$0xff]  }
 0x1e2   :  { %3489 = vmatpush1.bf16.msra.mxu0 %v5542_v45  ;;  %3833 = vmatpush1.bf16.msra.mxu1 %v5545_v46  ;;  %v117_v45 = vld [vmem:[#allocation2 + $0xf8] sm:$0xff]  ;;  %v5632_v46 = vld [vmem:[#allocation5 + $0xe00] ss:$16 sps:$4 sm:$0xff]  }
 0x1e3   :  { %3490 = vmatprep.subr.bf16.mxu0 %v5550_v47  ;;  %3834 = vmatprep.subr.bf16.mxu1 %v5553_v48  ;;  %v5635_v47 = vld [vmem:[#allocation5 + $0xe08] ss:$16 sps:$4 sm:$0xff]   ;;  %v5640_v48 = vld [vmem:[#allocation5 + $0xe24] ss:$16 sps:$4 sm:$0xff]  }
 0x1e6   :  { %3491 = vmatpush1.bf16.msra.mxu0 %v5548_v49  ;;  %3835 = vmatpush1.bf16.msra.mxu1 %v5551_v50  ;;  %v5643_v49 = vld [vmem:[#allocation5 + $0xe2c] ss:$16 sps:$4 sm:$0xff]   ;;  %v133_v50 = vpack.c.bf16 %v117_v45, %v101_v44  ;;  %v5725_v44 = vld [vmem:[#allocation5 + $0xfe8] ss:$16 sps:$4 sm:$0xff]   ;;  %v100_v45 = vld [vmem:[#allocation2 + $0x70] sm:$0xff] }
 0x1e7   :  { %3492 = vmatprep.subr.bf16.mxu0 %v5556_v51  ;;  %3836 = vmatprep.subr.bf16.mxu1 %v5559_v52  ;;  %v5638_v51 = vld [vmem:[#allocation5 + $0xe20] ss:$16 sps:$4 sm:$0xff]   ;;  %v5641_v52 = vld [vmem:[#allocation5 + $0xe28] ss:$16 sps:$4 sm:$0xff]  }
 0x1ea   :  { %3493 = vmatpush1.bf16.msra.mxu0 %v5554_v53  ;;  %3837 = vmatpush1.bf16.msra.mxu1 %v5557_v54  ;;  %v5646_v53 = vld [vmem:[#allocation5 + $0xe44] ss:$16 sps:$4 sm:$0xff]   ;;  %v5649_v54 = vld [vmem:[#allocation5 + $0xe4c] ss:$16 sps:$4 sm:$0xff]  }
 0x1eb   :  { %3494 = vmatprep.subr.bf16.mxu0 %v5562_v55  ;;  %3838 = vmatprep.subr.bf16.mxu1 %v5565_v56  ;;  %v5644_v55 = vld [vmem:[#allocation5 + $0xe40] ss:$16 sps:$4 sm:$0xff]   ;;  %v5647_v56 = vld [vmem:[#allocation5 + $0xe48] ss:$16 sps:$4 sm:$0xff]  }
 0x1ee   :  { %3495 = vmatpush1.bf16.msra.mxu0 %v5560_v57  ;;  %3839 = vmatpush1.bf16.msra.mxu1 %v5563_v58  ;;  %v5652_v57 = vld [vmem:[#allocation5 + $0xe64] ss:$16 sps:$4 sm:$0xff]   ;;  %v5655_v58 = vld [vmem:[#allocation5 + $0xe6c] ss:$16 sps:$4 sm:$0xff]  }
 0x1ef   :  { %3496 = vmatprep.subr.bf16.mxu0 %v5568_v59  ;;  %3840 = vmatprep.subr.bf16.mxu1 %v5571_v60  ;;  %v5650_v59 = vld [vmem:[#allocation5 + $0xe60] ss:$16 sps:$4 sm:$0xff]   ;;  %v5653_v60 = vld [vmem:[#allocation5 + $0xe68] ss:$16 sps:$4 sm:$0xff]  }
 0x1f2   :  { %3497 = vmatpush1.bf16.msra.mxu0 %v5566_v61  ;;  %3841 = vmatpush1.bf16.msra.mxu1 %v5569_v62  ;;  %v5658_v61 = vld [vmem:[#allocation5 + $0xe84] ss:$16 sps:$4 sm:$0xff]   ;;  %v5661_v62 = vld [vmem:[#allocation5 + $0xe8c] ss:$16 sps:$4 sm:$0xff]  }
 0x1f3   :  { %3498 = vmatprep.subr.bf16.mxu0 %v5574_v63  ;;  %3842 = vmatprep.subr.bf16.mxu1 %v5577_v0  ;;  %v5656_v63 = vld [vmem:[#allocation5 + $0xe80] ss:$16 sps:$4 sm:$0xff]   ;;  %v5659_v0 = vld [vmem:[#allocation5 + $0xe88] ss:$16 sps:$4 sm:$0xff]  }
 0x1f6   :  { %3499 = vmatpush1.bf16.msra.mxu0 %v5572_v1  ;;  %3843 = vmatpush1.bf16.msra.mxu1 %v5575_v2  ;;  %v5664_v1 = vld [vmem:[#allocation5 + $0xea4] ss:$16 sps:$4 sm:$0xff]   ;;  %v5667_v2 = vld [vmem:[#allocation5 + $0xeac] ss:$16 sps:$4 sm:$0xff]  }
 0x1f7   :  { %3500 = vmatprep.subr.bf16.mxu0 %v5580_v3  ;;  %3844 = vmatprep.subr.bf16.mxu1 %v5583_v4  ;;  %v5662_v3 = vld [vmem:[#allocation5 + $0xea0] ss:$16 sps:$4 sm:$0xff]   ;;  %v5665_v4 = vld [vmem:[#allocation5 + $0xea8] ss:$16 sps:$4 sm:$0xff]  }
 0x1fa   :  { %3501 = vmatpush1.bf16.msra.mxu0 %v5578_v5  ;;  %3845 = vmatpush1.bf16.msra.mxu1 %v5581_v6  ;;  %v5670_v5 = vld [vmem:[#allocation5 + $0xec4] ss:$16 sps:$4 sm:$0xff]   ;;  %v5673_v6 = vld [vmem:[#allocation5 + $0xecc] ss:$16 sps:$4 sm:$0xff]  }
 0x1fb   :  { %3502 = vmatprep.subr.bf16.mxu0 %v5586_v7  ;;  %3846 = vmatprep.subr.bf16.mxu1 %v5589_v8  ;;  %v5668_v7 = vld [vmem:[#allocation5 + $0xec0] ss:$16 sps:$4 sm:$0xff]   ;;  %v5671_v8 = vld [vmem:[#allocation5 + $0xec8] ss:$16 sps:$4 sm:$0xff]  }
 0x1fe   :  { %3503 = vmatpush1.bf16.msra.mxu0 %v5584_v9  ;;  %3847 = vmatpush1.bf16.msra.mxu1 %v5587_v10  ;;  %v5676_v9 = vld [vmem:[#allocation5 + $0xee4] ss:$16 sps:$4 sm:$0xff]   ;;  %v5679_v10 = vld [vmem:[#allocation5 + $0xeec] ss:$16 sps:$4 sm:$0xff]  }
 0x1ff   :  { %3504 = vmatprep.subr.bf16.mxu0 %v5592_v11  ;;  %3848 = vmatprep.subr.bf16.mxu1 %v5595_v12  ;;  %v5674_v11 = vld [vmem:[#allocation5 + $0xee0] ss:$16 sps:$4 sm:$0xff]   ;;  %v5677_v12 = vld [vmem:[#allocation5 + $0xee8] ss:$16 sps:$4 sm:$0xff]  }
 0x202   :  { %3505 = vmatpush1.bf16.msra.mxu0 %v5590_v13  ;;  %3849 = vmatpush1.bf16.msra.mxu1 %v5593_v14  ;;  %v5682_v13 = vld [vmem:[#allocation5 + $0xf04] ss:$16 sps:$4 sm:$0xff]   ;;  %v5685_v14 = vld [vmem:[#allocation5 + $0xf0c] ss:$16 sps:$4 sm:$0xff]  }
 0x203   :  { %3506 = vmatprep.subr.bf16.mxu0 %v5598_v15  ;;  %3850 = vmatprep.subr.bf16.mxu1 %v5601_v16  ;;  %v5680_v15 = vld [vmem:[#allocation5 + $0xf00] ss:$16 sps:$4 sm:$0xff]   ;;  %v5683_v16 = vld [vmem:[#allocation5 + $0xf08] ss:$16 sps:$4 sm:$0xff]  }
 0x206   :  { %3507 = vmatpush1.bf16.msra.mxu0 %v5596_v17  ;;  %3851 = vmatpush1.bf16.msra.mxu1 %v5599_v18  ;;  %v5688_v17 = vld [vmem:[#allocation5 + $0xf24] ss:$16 sps:$4 sm:$0xff]   ;;  %v5691_v18 = vld [vmem:[#allocation5 + $0xf2c] ss:$16 sps:$4 sm:$0xff]  }
 0x207   :  { %3508 = vmatprep.subr.bf16.mxu0 %v5604_v19  ;;  %3852 = vmatprep.subr.bf16.mxu1 %v5607_v20  ;;  %v5686_v19 = vld [vmem:[#allocation5 + $0xf20] ss:$16 sps:$4 sm:$0xff]   ;;  %v5689_v20 = vld [vmem:[#allocation5 + $0xf28] ss:$16 sps:$4 sm:$0xff]  }
 0x20a   :  { %3509 = vmatpush1.bf16.msra.mxu0 %v5602_v21  ;;  %3853 = vmatpush1.bf16.msra.mxu1 %v5605_v22  ;;  %v5694_v21 = vld [vmem:[#allocation5 + $0xf44] ss:$16 sps:$4 sm:$0xff]   ;;  %v5697_v22 = vld [vmem:[#allocation5 + $0xf4c] ss:$16 sps:$4 sm:$0xff]  }
 0x20b   :  { %3510 = vmatprep.subr.bf16.mxu0 %v5610_v23  ;;  %3854 = vmatprep.subr.bf16.mxu1 %v5613_v24  ;;  %v5692_v23 = vld [vmem:[#allocation5 + $0xf40] ss:$16 sps:$4 sm:$0xff]   ;;  %v5695_v24 = vld [vmem:[#allocation5 + $0xf48] ss:$16 sps:$4 sm:$0xff]  }
 0x20e   :  { %3511 = vmatpush1.bf16.msra.mxu0 %v5608_v25  ;;  %3855 = vmatpush1.bf16.msra.mxu1 %v5611_v26  ;;  %v5700_v25 = vld [vmem:[#allocation5 + $0xf64] ss:$16 sps:$4 sm:$0xff]   ;;  %v5703_v26 = vld [vmem:[#allocation5 + $0xf6c] ss:$16 sps:$4 sm:$0xff]  }
 0x20f   :  { %3512 = vmatprep.subr.bf16.mxu0 %v5616_v27  ;;  %3856 = vmatprep.subr.bf16.mxu1 %v5619_v28  ;;  %v5698_v27 = vld [vmem:[#allocation5 + $0xf60] ss:$16 sps:$4 sm:$0xff]   ;;  %v5701_v28 = vld [vmem:[#allocation5 + $0xf68] ss:$16 sps:$4 sm:$0xff]  }
 0x212   :  { %3513 = vmatpush1.bf16.msra.mxu0 %v5614_v29  ;;  %3857 = vmatpush1.bf16.msra.mxu1 %v5617_v30  ;;  %v5706_v29 = vld [vmem:[#allocation5 + $0xf84] ss:$16 sps:$4 sm:$0xff]   ;;  %v5709_v30 = vld [vmem:[#allocation5 + $0xf8c] ss:$16 sps:$4 sm:$0xff]  }
 0x213   :  { %3514 = vmatprep.subr.bf16.mxu0 %v5622_v31  ;;  %3858 = vmatprep.subr.bf16.mxu1 %v5625_v32  ;;  %v5704_v31 = vld [vmem:[#allocation5 + $0xf80] ss:$16 sps:$4 sm:$0xff]   ;;  %v5707_v32 = vld [vmem:[#allocation5 + $0xf88] ss:$16 sps:$4 sm:$0xff]  }
 0x216   :  { %3515 = vmatpush1.bf16.msra.mxu0 %v5620_v33  ;;  %3859 = vmatpush1.bf16.msra.mxu1 %v5623_v34  ;;  %v5712_v33 = vld [vmem:[#allocation5 + $0xfa4] ss:$16 sps:$4 sm:$0xff]   ;;  %v5715_v34 = vld [vmem:[#allocation5 + $0xfac] ss:$16 sps:$4 sm:$0xff]  }
 0x217   :  { %3516 = vmatprep.subr.bf16.mxu0 %v5628_v35  ;;  %3860 = vmatprep.subr.bf16.mxu1 %v5631_v36  ;;  %v5710_v35 = vld [vmem:[#allocation5 + $0xfa0] ss:$16 sps:$4 sm:$0xff]   ;;  %v5713_v36 = vld [vmem:[#allocation5 + $0xfa8] ss:$16 sps:$4 sm:$0xff]  }
 0x21a   :  { %3517 = vmatpush1.bf16.msra.mxu0 %v5626_v37  ;;  %3861 = vmatpush1.bf16.msra.mxu1 %v5629_v38  ;;  %v5718_v37 = vld [vmem:[#allocation5 + $0xfc4] ss:$16 sps:$4 sm:$0xff]   ;;  %v5721_v38 = vld [vmem:[#allocation5 + $0xfcc] ss:$16 sps:$4 sm:$0xff]  }
 0x21b   :  { %3529 = vmatprep.subr.bf16.mxu0 %v5634_v41  ;;  %3873 = vmatprep.subr.bf16.mxu1 %v5637_v42  ;;  %v5724_v41 = vld [vmem:[#allocation5 + $0xfe4] ss:$16 sps:$4 sm:$0xff]   ;;  %v5727_v42 = vld [vmem:[#allocation5 + $0xfec] ss:$16 sps:$4 sm:$0xff]  }
 0x21d   :  { %3519 = vmatmul.mubr.bf16.vlgmr.msra.gmra.mrb[0].mxu0 %v130_v43  ;;  %3863 = vmatmul.mubr.bf16.vlgmr.msra.gmra.mrb[0].mxu1 %v130_v43  ;;  %v5722_v43 = vld [vmem:[#allocation5 + $0xfe0] ss:$16 sps:$4 sm:$0xff]  }
 0x21e   :  { %3530 = vmatpush1.bf16.msra.mxu0 %v5632_v46  ;;  %3874 = vmatpush1.bf16.msra.mxu1 %v5635_v47  ;;  %v116_v46 = vld [vmem:[#allocation2 + $0xf0] sm:$0xff]  ;;  %v5728_v47 = vld [vmem:[#allocation8 + $0x40] sm:$0xff]  }
 0x21f   :  { %3531 = vmatprep.subr.bf16.mxu0 %v5640_v48  ;;  %3875 = vmatprep.subr.bf16.mxu1 %v5643_v49  ;;  %v5729_v48 = vld [vmem:[#allocation8 + $0xc0] sm:$0xff]   ;;  %v132_v49 = vpack.c.bf16 %v116_v46, %v100_v45 }
 0x220   :  { %3561 = vmatprep.mubr.bf16.mxu0 %v133_v50  ;;  %3905 = vmatprep.mubr.bf16.mxu1 %v133_v50  ;;  %v5730_v50 = vld [vmem:[#allocation8] sm:$0xff]  }
 0x222   :  { %3532 = vmatpush1.bf16.msra.mxu0 %v5638_v51  ;;  %3876 = vmatpush1.bf16.msra.mxu1 %v5641_v52  ;;  %v5731_v51 = vld [vmem:[#allocation8 + $0x80] sm:$0xff]   ;;  %v5732_v52 = vld [vmem:[#allocation8 + $0x48] sm:$0xff]  }
 0x223   :  { %3533 = vmatprep.subr.bf16.mxu0 %v5646_v53  ;;  %3877 = vmatprep.subr.bf16.mxu1 %v5649_v54  ;;  %v5733_v53 = vld [vmem:[#allocation8 + $0xc8] sm:$0xff]  }
 0x224   :  { %v5734_v54 = vld [vmem:[#allocation8 + $0x8] sm:$0xff]  }
 0x226   :  { %3534 = vmatpush1.bf16.msra.mxu0 %v5644_v55  ;;  %3878 = vmatpush1.bf16.msra.mxu1 %v5647_v56  ;;  %v5735_v55 = vld [vmem:[#allocation8 + $0x88] sm:$0xff]   ;;  %v5736_v56 = vld [vmem:[#allocation8 + $0x50] sm:$0xff]  }
 0x227   :  { %3535 = vmatprep.subr.bf16.mxu0 %v5652_v57  ;;  %3879 = vmatprep.subr.bf16.mxu1 %v5655_v58  ;;  %v5737_v57 = vld [vmem:[#allocation8 + $0xd0] sm:$0xff]  }
 0x228   :  { %v5738_v58 = vld [vmem:[#allocation8 + $0x10] sm:$0xff]  }
 0x22a   :  { %3536 = vmatpush1.bf16.msra.mxu0 %v5650_v59  ;;  %3880 = vmatpush1.bf16.msra.mxu1 %v5653_v60  ;;  %v5739_v59 = vld [vmem:[#allocation8 + $0x90] sm:$0xff]   ;;  %v5740_v60 = vld [vmem:[#allocation8 + $0x58] sm:$0xff]  }
 0x22b   :  { %3537 = vmatprep.subr.bf16.mxu0 %v5658_v61  ;;  %3881 = vmatprep.subr.bf16.mxu1 %v5661_v62  ;;  %v5741_v61 = vld [vmem:[#allocation8 + $0xd8] sm:$0xff]  }
 0x22c   :  { %v5742_v62 = vld [vmem:[#allocation8 + $0x18] sm:$0xff]  }
 0x22e   :  { %3538 = vmatpush1.bf16.msra.mxu0 %v5656_v63  ;;  %3882 = vmatpush1.bf16.msra.mxu1 %v5659_v0  ;;  %v5743_v63 = vld [vmem:[#allocation8 + $0x98] sm:$0xff]   ;;  %v5744_v0 = vld [vmem:[#allocation8 + $0x60] sm:$0xff]  }
 0x22f   :  { %3539 = vmatprep.subr.bf16.mxu0 %v5664_v1  ;;  %3883 = vmatprep.subr.bf16.mxu1 %v5667_v2  ;;  %v5745_v1 = vld [vmem:[#allocation8 + $0xe0] sm:$0xff]  }
 0x230   :  { %v5746_v2 = vld [vmem:[#allocation8 + $0x20] sm:$0xff]  }
 0x232   :  { %3540 = vmatpush1.bf16.msra.mxu0 %v5662_v3  ;;  %3884 = vmatpush1.bf16.msra.mxu1 %v5665_v4  ;;  %v5747_v3 = vld [vmem:[#allocation8 + $0xa0] sm:$0xff]   ;;  %v5748_v4 = vld [vmem:[#allocation8 + $0x68] sm:$0xff]  }
 0x233   :  { %3541 = vmatprep.subr.bf16.mxu0 %v5670_v5  ;;  %3885 = vmatprep.subr.bf16.mxu1 %v5673_v6  ;;  %v5749_v5 = vld [vmem:[#allocation8 + $0xe8] sm:$0xff]  }
 0x234   :  { %v5750_v6 = vld [vmem:[#allocation8 + $0x28] sm:$0xff]  }
 0x236   :  { %3542 = vmatpush1.bf16.msra.mxu0 %v5668_v7  ;;  %3886 = vmatpush1.bf16.msra.mxu1 %v5671_v8  ;;  %v5751_v7 = vld [vmem:[#allocation8 + $0xa8] sm:$0xff]   ;;  %v5752_v8 = vld [vmem:[#allocation8 + $0x70] sm:$0xff]  }
 0x237   :  { %3543 = vmatprep.subr.bf16.mxu0 %v5676_v9  ;;  %3887 = vmatprep.subr.bf16.mxu1 %v5679_v10  ;;  %v5753_v9 = vld [vmem:[#allocation8 + $0xf0] sm:$0xff]  }
 0x238   :  { %v5754_v10 = vld [vmem:[#allocation8 + $0x30] sm:$0xff]  }
 0x23a   :  { %3544 = vmatpush1.bf16.msra.mxu0 %v5674_v11  ;;  %3888 = vmatpush1.bf16.msra.mxu1 %v5677_v12  ;;  %v5755_v11 = vld [vmem:[#allocation8 + $0xb0] sm:$0xff]   ;;  %v5756_v12 = vld [vmem:[#allocation8 + $0x78] sm:$0xff]  }
 0x23b   :  { %3545 = vmatprep.subr.bf16.mxu0 %v5682_v13  ;;  %3889 = vmatprep.subr.bf16.mxu1 %v5685_v14  ;;  %v5757_v13 = vld [vmem:[#allocation8 + $0xf8] sm:$0xff]  }
 0x23c   :  { %v5758_v14 = vld [vmem:[#allocation8 + $0x38] sm:$0xff]  }
 0x23e   :  { %3546 = vmatpush1.bf16.msra.mxu0 %v5680_v15  ;;  %3890 = vmatpush1.bf16.msra.mxu1 %v5683_v16  ;;  %v5759_v15 = vld [vmem:[#allocation8 + $0xb8] sm:$0xff]   ;;  %v648_v16 = vlaneseq }
 0x23f   :  { %3547 = vmatprep.subr.bf16.mxu0 %v5688_v17  ;;  %3891 = vmatprep.subr.bf16.mxu1 %v5691_v18 }
 0x240   :  { %v649_v17 = vshrl.u32 %v648_v16, 7 }
 0x242   :  { %3548 = vmatpush1.bf16.msra.mxu0 %v5686_v19  ;;  %3892 = vmatpush1.bf16.msra.mxu1 %v5689_v20  ;;  %v650_v18 = vsub.s32 0, %v649_v17  ;;  %v658_v19 = vsub.s32 2, %v649_v17  ;;  %v646_v20 = vld [vmem:[#allocation7] sm:$0xf] }
 0x243   :  { %3549 = vmatprep.subr.bf16.mxu0 %v5694_v21  ;;  %3893 = vmatprep.subr.bf16.mxu1 %v5697_v22  ;;  %v654_v21 = vsub.s32 1, %v649_v17  ;;  %v662_v22 = vsub.s32 3, %v649_v17 }
 0x246   :  { %3550 = vmatpush1.bf16.msra.mxu0 %v5692_v23  ;;  %3894 = vmatpush1.bf16.msra.mxu1 %v5695_v24  ;;  %v651_v23 = vrot.slane %v646_v20, %v650_v18  ;;  %v659_v24 = vrot.slane %v646_v20, %v658_v19 }
 0x247   :  { %3551 = vmatprep.subr.bf16.mxu0 %v5700_v25  ;;  %3895 = vmatprep.subr.bf16.mxu1 %v5703_v26  ;;  %v655_v25 = vrot.slane %v646_v20, %v654_v21  ;;  %v663_v26 = vrot.slane %v646_v20, %v662_v22 }
 0x24a   :  { %3552 = vmatpush1.bf16.msra.mxu0 %v5698_v27  ;;  %3896 = vmatpush1.bf16.msra.mxu1 %v5701_v28 }
 0x24b   :  { %3553 = vmatprep.subr.bf16.mxu0 %v5706_v29  ;;  %3897 = vmatprep.subr.bf16.mxu1 %v5709_v30 }
 0x24e   :  { %3554 = vmatpush1.bf16.msra.mxu0 %v5704_v31  ;;  %3898 = vmatpush1.bf16.msra.mxu1 %v5707_v32 }
 0x24f   :  { %3555 = vmatprep.subr.bf16.mxu0 %v5712_v33  ;;  %3899 = vmatprep.subr.bf16.mxu1 %v5715_v34 }
 0x252   :  { %3556 = vmatpush1.bf16.msra.mxu0 %v5710_v35  ;;  %3900 = vmatpush1.bf16.msra.mxu1 %v5713_v36 }
 0x253   :  { %3557 = vmatprep.subr.bf16.mxu0 %v5718_v37  ;;  %3901 = vmatprep.subr.bf16.mxu1 %v5721_v38 }
 0x256   :  { %3558 = vmatpush1.bf16.msra.mxu0 %v5716_v39  ;;  %3902 = vmatpush1.bf16.msra.mxu1 %v5719_v40 }
 0x257   :  { %3559 = vmatprep.subr.bf16.mxu0 %v5724_v41  ;;  %3903 = vmatprep.subr.bf16.mxu1 %v5727_v42 }
 0x25a   :  { %3560 = vmatpush1.bf16.msra.mxu0 %v5722_v43  ;;  %3904 = vmatpush1.bf16.msra.mxu1 %v5725_v44 }
 0x25b   :  { %4839 = vmatprep.subr.bf16.mxu0 %v5728_v47  ;;  %4861 = vmatprep.subr.bf16.mxu1 %v5729_v48 }
 0x25d   :  { %3562 = vmatmul.mubr.bf16.vlgmr.msra.gmra.mrb[0].mxu0 %v132_v49  ;;  %3906 = vmatmul.mubr.bf16.vlgmr.msra.gmra.mrb[0].mxu1 %v132_v49 }
 0x25e   :  { %4840 = vmatpush3.bf16.msra.mxu0 %v5730_v50  ;;  %4862 = vmatpush3.bf16.msra.mxu1 %v5731_v51 }
 0x25f   :  { %4841 = vmatprep.subr.bf16.mxu0 %v5732_v52  ;;  %4863 = vmatprep.subr.bf16.mxu1 %v5733_v53 }
 0x262   :  { %4842 = vmatpush3.bf16.msra.mxu0 %v5734_v54  ;;  %4864 = vmatpush3.bf16.msra.mxu1 %v5735_v55 }
 0x263   :  { %4843 = vmatprep.subr.bf16.mxu0 %v5736_v56  ;;  %4865 = vmatprep.subr.bf16.mxu1 %v5737_v57  ;;  %v4806_v57 = vld [vmem:[#allocation10] ss:$0 sm:$0xff] }
 0x266   :  { %4844 = vmatpush3.bf16.msra.mxu0 %v5738_v58  ;;  %4866 = vmatpush3.bf16.msra.mxu1 %v5739_v59 }
 0x267   :  { %4845 = vmatprep.subr.bf16.mxu0 %v5740_v60  ;;  %4867 = vmatprep.subr.bf16.mxu1 %v5741_v61 }
 0x26a   :  { %4846 = vmatpush3.bf16.msra.mxu0 %v5742_v62  ;;  %4868 = vmatpush3.bf16.msra.mxu1 %v5743_v63 }
 0x26b   :  { %4847 = vmatprep.subr.bf16.mxu0 %v5744_v0  ;;  %4869 = vmatprep.subr.bf16.mxu1 %v5745_v1 }
 0x26e   :  { %4848 = vmatpush3.bf16.msra.mxu0 %v5746_v2  ;;  %4870 = vmatpush3.bf16.msra.mxu1 %v5747_v3 }
 0x26f   :  { %4849 = vmatprep.subr.bf16.mxu0 %v5748_v4  ;;  %4871 = vmatprep.subr.bf16.mxu1 %v5749_v5 }
 0x272   :  { %4850 = vmatpush3.bf16.msra.mxu0 %v5750_v6  ;;  %4872 = vmatpush3.bf16.msra.mxu1 %v5751_v7 }
 0x273   :  { %4851 = vmatprep.subr.bf16.mxu0 %v5752_v8  ;;  %4873 = vmatprep.subr.bf16.mxu1 %v5753_v9 }
 0x276   :  { %4852 = vmatpush3.bf16.msra.mxu0 %v5754_v10  ;;  %4874 = vmatpush3.bf16.msra.mxu1 %v5755_v11 }
 0x277   :  { %4853 = vmatprep.subr.bf16.mxu0 %v5756_v12  ;;  %4875 = vmatprep.subr.bf16.mxu1 %v5757_v13 }
 0x27a   :  { %4854 = vmatpush3.bf16.msra.mxu0 %v5758_v14  ;;  %4876 = vmatpush3.bf16.msra.mxu1 %v5759_v15 }
 0x330   :  { %v3563_v27 = vpop.f32.mrb[0].mxu0  ;;  %v3907_v28 = vpop.f32.mrb[0].mxu1 }
 0x331   :  { %v4883_v29 = vadd.f32 %v3563_v27, %v651_v23  ;;  %v4887_v30 = vadd.f32 %v3907_v28, %v659_v24  ;;  %v3565_v31 = vpop.f32.mrb[1].mxu0  ;;  %v3909_v32 = vpop.f32.mrb[1].mxu1 }
 0x332   :  { %v4884_v33 = vadd.f32 %v3565_v31, %v655_v25  ;;  %v4888_v34 = vadd.f32 %v3909_v32, %v663_v26  ;;  %v3567_v35 = vpop.f32.mrb[2].mxu0  ;;  %v3911_v36 = vpop.f32.mrb[2].mxu1 }
 0x333   :  { %v4885_v37 = vadd.f32 %v3567_v35, %v651_v23  ;;  %v4889_v38 = vadd.f32 %v3911_v36, %v659_v24  ;;  %v3569_v39 = vpop.f32.mrb[3].mxu0  ;;  %v3913_v40 = vpop.f32.mrb[3].mxu1  ;;  %v3916_v43 = vmax.f32 %v4883_v29, 0.0  ;;  %v3918_v44 = vmax.f32 %v4887_v30, 0.0 }
 0x334   :  { %v4886_v41 = vadd.f32 %v3569_v39, %v655_v25  ;;  %v4890_v42 = vadd.f32 %v3913_v40, %v663_v26  ;;  %v3917_v47 = vmax.f32 %v4884_v33, 0.0  ;;  %v3919_v48 = vmax.f32 %v4888_v34, 0.0 }
 0x335   :  { %v3920_v45 = vmax.f32 %v4885_v37, 0.0  ;;  %v3922_v46 = vmax.f32 %v4889_v38, 0.0 }
 0x336   :  { %v3921_v49 = vmax.f32 %v4886_v41, 0.0  ;;  %v3923_v50 = vmax.f32 %v4890_v42, 0.0 }
 0x337   :  { %v3924_v51 = vpack.c.bf16 %v3920_v45, %v3916_v43  ;;  %v3926_v52 = vpack.c.bf16 %v3922_v46, %v3918_v44 }
 0x338   :  { %v3925_v53 = vpack.c.bf16 %v3921_v49, %v3917_v47  ;;  %v3927_v54 = vpack.c.bf16 %v3923_v50, %v3919_v48 }
 0x33a   :  { %4223 = vmatprep.mubr.bf16.mxu0 %v3925_v53  ;;  %4264 = vmatprep.mubr.bf16.mxu1 %v3927_v54 }
 0x33b   :  { %4224 = vmatmul.mubr.bf16.vlgmr.msra.gmra.mrb[4].mxu0 %v3924_v51  ;;  %4265 = vmatmul.mubr.bf16.vlgmr.msra.gmra.mrb[4].mxu1 %v3926_v52 }
 0x40e   :  { %v4855_v55 = vpop.f32.mrb[4].mxu0  ;;  %v4877_v56 = vpop.f32.mrb[4].mxu1 }
 0x40f   :  { %v4856_v58 = vpop.f32.mrb[5].mxu0  ;;  %v4878_v59 = vpop.f32.mrb[5].mxu1 }
 0x410   :  { %v4857_v60 = vadd.f32 %v4856_v58, %v4855_v55  ;;  %v4879_v61 = vadd.f32 %v4878_v59, %v4877_v56  ;;  %v4858_v62 = vpop.f32.mrb[6].mxu0  ;;  %v4880_v63 = vpop.f32.mrb[6].mxu1 }
 0x411   :  { %v4859_v0 = vpop.f32.mrb[7].mxu0  ;;  %v4881_v1 = vpop.f32.mrb[7].mxu1 }
 0x412   :  { %v4226_v2 = vadd.f32 %v4857_v60, %v4806_v57  ;;  %v4860_v3 = vadd.f32 %v4859_v0, %v4858_v62  ;;  %v4882_v4 = vadd.f32 %v4881_v1, %v4880_v63 }
 0x414   :  { %v4267_v5 = vadd.f32 %v4879_v61, %v4226_v2  ;;  %v4229_v6 = vadd.f32 %v4860_v3, %v4806_v57 }
 0x416   :  { %4273 = vst [vmem:[#allocation11] sm:$0xff] %v4267_v5  ;;  %v4270_v7 = vadd.f32 %v4882_v4, %v4229_v6 }
 0x418   :  { %4274 = vst [vmem:[#allocation11 + $0x8] sm:$0xff] %v4270_v7 }
 0x419   :  { %5881 = shalt.err (!%p5878_p2)
}
 0x41a   :  { %s5882_s9 = scalar_lea.hbm %s6023_s5, 256 }
 0x41b   :  { %p5883_p3 = scmp.ne.s32.totalorder %s6023_s5, %s5882_s9  ;;  %p5886_p4 = scmp.lt.u32.totalorder %s5882_s9, %s6023_s5 }
 0x41d   :  { %p5888_p5 = pnand %p5886_p4, %p5883_p3 }
 0x41f   :  { %5891 = shalt.err (!%p5888_p5)
}
 0x420   :  { %s5912_s14 = smov 8  }
 0x421   :  { %4286 = dma.vmem_to_hbm [thread:$0]  %s4281_s3, 256, %s6023_s5, [#allocation4], %s5908_s30, %s5908_s30, %s5912_s14  }
 0x422   :  { %5898 = dma.done.wait [#allocation4], 256  }
 0x423   :  { %5899 = vsyncadd [#allocation4], 4294967040 }
 0x424   :  { %4290 = vsyncpa [#allocation3], 1 }
 0x425   :  { %4291 = vsyncpa [#allocation6], 1 }
 0x426   :  { %4292 = vsyncpa [#allocation9], 1 }
 0x427   :  { %4293 = vsyncpa [#allocation4], 1 }

</bundles_post_ra>
